<compile_context>
chip_gen: v7x
topology: tpu7x:2x2x1
jax: 0.10.0
libtpu: 0.0.40
codegen_flags: <defaults>
</compile_context>

<pallas_src>
import jax
import jax.numpy as jnp
import numpy as np
from jax.experimental import pallas as pl
from jax.experimental.pallas import tpu as pltpu


# --------------------------------------------------------------------------
# Attention hop kernel
# --------------------------------------------------------------------------
def _attention_kernel(q_ref, im_ref, wim_ref, wq_ref, b1_ref, w2_ref, attn_ref):
    # q_ref:   (Bt, Dq)     bf16   question features for this batch tile
    # im_ref:  (Bt*N, Dim)  bf16   object features, N objects contiguous per elem
    # wim_ref: (Dim, H) bf16, wq_ref: (Dq, H) bf16    (split of W1 across concat)
    # b1_ref:  (1, H) f32,  w2_ref: (1, H) f32
    # attn_ref:(Bt, N) f32  softmax attention weights (row-major per batch elem)
    Bt, N = attn_ref.shape
    H = wim_ref.shape[1]

    # First Linear, split across the (imfeat, qtile) concat -> no concat needed.
    him = jnp.dot(im_ref[...], wim_ref[...],
                  preferred_element_type=jnp.float32)            # (Bt*N, H) f32
    hq = jnp.dot(q_ref[...], wq_ref[...],
                 preferred_element_type=jnp.float32)             # (Bt, H)   f32

    # Broadcast the once-per-element q projection over its N object rows (VPU).
    h = him.reshape(Bt, N, H) + hq[:, None, :] + b1_ref[...]
    h = jnp.maximum(h, 0.0)
    # TODO(synk): nn.Dropout is identity in eval mode; training-mode random
    # masking is not reproduced here.

    # Second Linear (1024 -> 1) as mul + lane reduction, landing directly in the
    # (Bt, N) row-major layout of the output block.  attnmap bias omitted:
    # softmax is shift-invariant so the scalar bias is an exact no-op.
    logits = jnp.sum(h * w2_ref[...], axis=-1)                   # (Bt, N) f32

    # Softmax over the N objects of each batch element.
    m = jnp.max(logits, axis=-1, keepdims=True)
    e = jnp.exp(logits - m)
    denom = jnp.sum(e, axis=-1, keepdims=True)
    attn_ref[...] = e * pl.reciprocal(denom, approx=True)


def attention_forward(qfeat, imfeat, params, *, block_b=128):
    """qfeat (B, Dq) f32, imfeat (B, N, Dim) f32 -> attention map (B, N, 1) f32."""
    B, Dq = qfeat.shape
    Bi, N, Dim = imfeat.shape
    assert Bi == B
    w_im, w_q, b1, w2 = params
    H = w_im.shape[1]

    Bt = min(block_b, B)
    assert B % Bt == 0, "batch must divide the batch tile"

    # bf16 on the MXU path only; elementwise / softmax path stays f32.
    q_bf = qfeat.astype(jnp.bfloat16)
    im_bf = imfeat.reshape(B * N, Dim).astype(jnp.bfloat16)
    wim_bf = w_im.astype(jnp.bfloat16)
    wq_bf = w_q.astype(jnp.bfloat16)

    attn = pl.pallas_call(
        _attention_kernel,
        out_shape=jax.ShapeDtypeStruct((B, N), jnp.float32),
        grid_spec=pltpu.PrefetchScalarGridSpec(
            num_scalar_prefetch=0,
            grid=(B // Bt,),
            in_specs=[
                pl.BlockSpec((Bt, Dq), lambda b: (b, 0)),        # qfeat tile
                pl.BlockSpec((Bt * N, Dim), lambda b: (b, 0)),   # imfeat rows
                pl.BlockSpec((Dim, H), lambda b: (0, 0)),        # W1[:Dim]
                pl.BlockSpec((Dq, H), lambda b: (0, 0)),         # W1[Dim:]
                pl.BlockSpec((1, H), lambda b: (0, 0)),          # b1
                pl.BlockSpec((1, H), lambda b: (0, 0)),          # w2 (attnmap)
            ],
            out_specs=pl.BlockSpec((Bt, N), lambda b: (b, 0)),
        ),
        compiler_params=pltpu.CompilerParams(
            dimension_semantics=("parallel",)),
    )(q_bf, im_bf, wim_bf, wq_bf, b1, w2)
    return attn[..., None]                                       # (B, N, 1)


# --------------------------------------------------------------------------
# Classifier kernel (relu(Linear) -> Linear)
# --------------------------------------------------------------------------
def _classifier_kernel(x_ref, w1_ref, b1_ref, w2_ref, b2_ref, out_ref):
    h = jnp.dot(x_ref[...], w1_ref[...],
                preferred_element_type=jnp.float32) + b1_ref[...]
    h = jnp.maximum(h, 0.0)
    # TODO(synk): dropout identity (eval mode).
    out_ref[...] = (jnp.dot(h, w2_ref[...],
                            preferred_element_type=jnp.float32) + b2_ref[...])


def classifier_forward(feat, params, *, block_b=128):
    B, F = feat.shape
    w1, b1, w2, b2 = params
    Hc = w1.shape[1]
    C = w2.shape[1]
    Bt = min(block_b, B)
    assert B % Bt == 0
    return pl.pallas_call(
        _classifier_kernel,
        out_shape=jax.ShapeDtypeStruct((B, C), jnp.float32),
        grid_spec=pltpu.PrefetchScalarGridSpec(
            num_scalar_prefetch=0,
            grid=(B // Bt,),
            in_specs=[
                pl.BlockSpec((Bt, F), lambda b: (b, 0)),
                pl.BlockSpec((F, Hc), lambda b: (0, 0)),
                pl.BlockSpec((1, Hc), lambda b: (0, 0)),
                pl.BlockSpec((Hc, C), lambda b: (0, 0)),
                pl.BlockSpec((1, C), lambda b: (0, 0)),
            ],
            out_specs=pl.BlockSpec((Bt, C), lambda b: (b, 0)),
        ),
        compiler_params=pltpu.CompilerParams(
            dimension_semantics=("parallel",)),
    )(feat, w1, b1, w2, b2)


# --------------------------------------------------------------------------
# Full UpDown forward (use_lstm=False path)
# --------------------------------------------------------------------------
def updown_forward(qfeat, imfeat, attn_params, cls_params, *, block_b=128):
    # TODO(synk): the use_lstm=True path (WordEmbedding + packed-sequence LSTM
    # QuestionEncoder) has no clean Pallas equivalent and is not implemented;
    # this is the use_lstm=False branch where qfeat == q.
    feats = [qfeat]
    attn_maps = []
    for hop_params in attn_params:
        attn = attention_forward(qfeat, imfeat, hop_params, block_b=block_b)
        attn_maps.append(attn)
        # (attn_map * imfeat).sum(1) on the original f32 imfeat — tiny, XLA.
        feats.append(jnp.sum(attn * imfeat, axis=1))
    concat_feat = jnp.concatenate(feats, axis=1)      # [qfeat, scaled_0, scaled_1, ...]
    preds = classifier_forward(concat_feat, cls_params, block_b=block_b)
    return preds, attn_maps


# --------------------------------------------------------------------------
# Pure-JAX reference (mirrors the PyTorch module).  mxu_dtype=bf16 reproduces
# the kernel's deliberate bf16 MXU path for a tight numerical check.
# --------------------------------------------------------------------------
def _updown_reference(qfeat, imfeat, attn_params, cls_params,
                      mxu_dtype=jnp.float32):
    B, N, Dim = imfeat.shape
    hi = jax.lax.Precision.HIGHEST
    q_m = qfeat.astype(mxu_dtype)
    im_m = imfeat.astype(mxu_dtype)
    feats = [qfeat]
    attn_maps = []
    for (w_im, w_q, b1, w2) in attn_params:
        qtile = jnp.broadcast_to(q_m[:, None, :], (B, N, q_m.shape[-1]))
        qi = jnp.concatenate([im_m, qtile], axis=2)
        w1 = jnp.concatenate([w_im, w_q], axis=0).astype(mxu_dtype)
        h = jnp.einsum("bnd,dh->bnh", qi, w1,
                       preferred_element_type=jnp.float32, precision=hi)
        h = jnp.maximum(h + b1[0], 0.0)
        logits = jnp.sum(h * w2[0], axis=-1, keepdims=True)   # attnmap bias: no-op
        attn = jax.nn.softmax(logits, axis=1)
        attn_maps.append(attn)
        feats.append(jnp.sum(attn * imfeat, axis=1))
    concat_feat = jnp.concatenate(feats, axis=1)
    cw1, cb1, cw2, cb2 = cls_params
    hidden = jnp.maximum(
        jnp.matmul(concat_feat, cw1, precision=hi) + cb1[0], 0.0)
    preds = jnp.matmul(hidden, cw2, precision=hi) + cb2[0]
    return preds, attn_maps


if __name__ == "__main__":
    # Small shapes consistent with UpDown (H=1024 is hardcoded by Attention).
    B, N = 8, 8          # batch, num_objs
    Dim = 32             # config.cnn_feat_size
    Dq = 32              # qfeat width (real module: 2048 or lstm_out*[1|2])
    H = 1024             # Attention hidden width, nn.Linear(..., 1024)
    HOPS = 2             # config.num_attn_hops
    HID = 64             # config.num_hidden * 2
    C = 16               # config.num_classes

    key = jax.random.PRNGKey(0)
    kit = iter(jax.random.split(key, 2 + 3 * HOPS + 4))

    qfeat = jax.random.normal(next(kit), (B, Dq), jnp.float32)
    imfeat = jax.random.normal(next(kit), (B, N, Dim), jnp.float32)

    # Per-hop Attention params (torch nn.Linear-style uniform init).
    s1 = 1.0 / np.sqrt(Dim + Dq)
    s2 = 1.0 / np.sqrt(H)
    attn_params = []
    for _ in range(HOPS):
        w1_full = jax.random.uniform(next(kit), (Dim + Dq, H), jnp.float32, -s1, s1)
        b1 = jax.random.uniform(next(kit), (1, H), jnp.float32, -s1, s1)
        w2 = jax.random.uniform(next(kit), (1, H), jnp.float32, -s2, s2)
        # attnmap bias intentionally omitted (softmax shift-invariance -> no-op).
        attn_params.append((w1_full[:Dim], w1_full[Dim:], b1, w2))

    # Classifier params.
    F = Dq + Dim * HOPS
    sc1 = 1.0 / np.sqrt(F)
    sc2 = 1.0 / np.sqrt(HID)
    cw1 = jax.random.uniform(next(kit), (F, HID), jnp.float32, -sc1, sc1)
    cb1 = jax.random.uniform(next(kit), (1, HID), jnp.float32, -sc1, sc1)
    cw2 = jax.random.uniform(next(kit), (HID, C), jnp.float32, -sc2, sc2)
    cb2 = jax.random.uniform(next(kit), (1, C), jnp.float32, -sc2, sc2)
    cls_params = (cw1, cb1, cw2, cb2)

    fwd = jax.jit(updown_forward)
    preds, attn_maps = fwd(qfeat, imfeat, attn_params, cls_params)
    jax.block_until_ready((preds, attn_maps))
    assert preds.shape == (B, C)
    for a in attn_maps:
        assert a.shape == (B, N, 1)

    # Tight check vs a reference with the same bf16 MXU numerics as the kernel.
    ref_preds_bf, ref_attn_bf = _updown_reference(
        qfeat, imfeat, attn_params, cls_params, mxu_dtype=jnp.bfloat16)
    for a, r in zip(attn_maps, ref_attn_bf):
        np.testing.assert_allclose(np.asarray(a), np.asarray(r),
                                   rtol=1e-2, atol=5e-3)
    np.testing.assert_allclose(np.asarray(preds), np.asarray(ref_preds_bf),
                               rtol=1e-2, atol=5e-3)

    # Loose check vs the full-f32 module (bounds the bf16 weight-cast error).
    ref_preds_f32, ref_attn_f32 = _updown_reference(
        qfeat, imfeat, attn_params, cls_params, mxu_dtype=jnp.float32)
    for a, r in zip(attn_maps, ref_attn_f32):
        np.testing.assert_allclose(np.asarray(a), np.asarray(r),
                                   rtol=5e-2, atol=1e-2)
    np.testing.assert_allclose(np.asarray(preds), np.asarray(ref_preds_f32),
                               rtol=5e-2, atol=3e-2)

    print("KERNEL_OK")
</pallas_src>

<mosaic_0001>
module attributes {stable_mosaic.version = 11 : i64} {
  func.func @_attention_kernel(%arg0: i32, %arg1: memref<8x32xbf16, #tpu.memory_space<vmem>>, %arg2: memref<64x32xbf16, #tpu.memory_space<vmem>>, %arg3: memref<32x1024xbf16, #tpu.memory_space<vmem>>, %arg4: memref<32x1024xbf16, #tpu.memory_space<vmem>>, %arg5: memref<1x1024xf32, #tpu.memory_space<vmem>>, %arg6: memref<1x1024xf32, #tpu.memory_space<vmem>>, %arg7: memref<8x8xf32, #tpu.memory_space<vmem>>) attributes {dimension_semantics = [#tpu.dimension_semantics<parallel>], iteration_bounds = array<i64: 1>, scalar_prefetch = 0 : i64, scratch_operands = 0 : i64, tpu.core_type = #tpu.core_type<tc>, window_params = [{transform_indices = @transform_0, window_bounds = array<i64: 8, 32>}, {transform_indices = @transform_1, window_bounds = array<i64: 64, 32>}, {pipeline_mode = #tpu.pipeline_mode<synchronous>, transform_indices = @transform_2, window_bounds = array<i64: 32, 1024>}, {pipeline_mode = #tpu.pipeline_mode<synchronous>, transform_indices = @transform_3, window_bounds = array<i64: 32, 1024>}, {pipeline_mode = #tpu.pipeline_mode<synchronous>, transform_indices = @transform_4, window_bounds = array<i64: 1, 1024>}, {pipeline_mode = #tpu.pipeline_mode<synchronous>, transform_indices = @transform_5, window_bounds = array<i64: 1, 1024>}, {transform_indices = @transform_6, window_bounds = array<i64: 8, 8>}]} {
    %c0 = arith.constant 0 : index
    %c0_0 = arith.constant 0 : index
    %0 = vector.load %arg2[%c0, %c0_0] : memref<64x32xbf16, #tpu.memory_space<vmem>>, vector<64x32xbf16>
    %c0_1 = arith.constant 0 : index
    %c0_2 = arith.constant 0 : index
    %1 = vector.load %arg3[%c0_1, %c0_2] : memref<32x1024xbf16, #tpu.memory_space<vmem>>, vector<32x1024xbf16>
    %cst = arith.constant dense<0.000000e+00> : vector<64x1024xf32>
    %2 = tpu.matmul %0, %1, %cst {dimension_numbers = #tpu.dot_dimension_numbers<[1], [0], [0], [1], [0, 0, 1, 1], [], []>} : vector<64x32xbf16>, vector<32x1024xbf16>, vector<64x1024xf32> -> vector<64x1024xf32>
    %c0_3 = arith.constant 0 : index
    %c0_4 = arith.constant 0 : index
    %3 = vector.load %arg1[%c0_3, %c0_4] : memref<8x32xbf16, #tpu.memory_space<vmem>>, vector<8x32xbf16>
    %c0_5 = arith.constant 0 : index
    %c0_6 = arith.constant 0 : index
    %4 = vector.load %arg4[%c0_5, %c0_6] : memref<32x1024xbf16, #tpu.memory_space<vmem>>, vector<32x1024xbf16>
    %cst_7 = arith.constant dense<0.000000e+00> : vector<8x1024xf32>
    %5 = tpu.matmul %3, %4, %cst_7 {dimension_numbers = #tpu.dot_dimension_numbers<[1], [0], [0], [1], [0, 0, 1, 1], [], []>} : vector<8x32xbf16>, vector<32x1024xbf16>, vector<8x1024xf32> -> vector<8x1024xf32>
    %6 = vector.shape_cast %2 : vector<64x1024xf32> to vector<8x8x1024xf32>
    %7 = vector.shape_cast %5 : vector<8x1024xf32> to vector<8x1x1024xf32>
    %8 = vector.broadcast %7 : vector<8x1x1024xf32> to vector<8x8x1024xf32>
    %9 = arith.addf %6, %8 : vector<8x8x1024xf32>
    %c0_8 = arith.constant 0 : index
    %c0_9 = arith.constant 0 : index
    %10 = vector.load %arg5[%c0_8, %c0_9] : memref<1x1024xf32, #tpu.memory_space<vmem>>, vector<1x1024xf32>
    %11 = vector.shape_cast %10 : vector<1x1024xf32> to vector<1x1x1024xf32>
    %12 = vector.broadcast %11 : vector<1x1x1024xf32> to vector<8x8x1024xf32>
    %13 = arith.addf %9, %12 : vector<8x8x1024xf32>
    %cst_10 = arith.constant 0.000000e+00 : f32
    %14 = vector.broadcast %cst_10 : f32 to vector<8x8x1024xf32>
    %15 = arith.maximumf %13, %14 : vector<8x8x1024xf32>
    %c0_11 = arith.constant 0 : index
    %c0_12 = arith.constant 0 : index
    %16 = vector.load %arg6[%c0_11, %c0_12] : memref<1x1024xf32, #tpu.memory_space<vmem>>, vector<1x1024xf32>
    %17 = vector.shape_cast %16 : vector<1x1024xf32> to vector<1x1x1024xf32>
    %18 = vector.broadcast %17 : vector<1x1x1024xf32> to vector<8x8x1024xf32>
    %19 = arith.mulf %15, %18 : vector<8x8x1024xf32>
    %cst_13 = arith.constant dense<0.000000e+00> : vector<8x8xf32>
    %20 = vector.multi_reduction <add>, %19, %cst_13 [2] : vector<8x8x1024xf32> to vector<8x8xf32>
    %cst_14 = arith.constant dense<0xFF800000> : vector<8xf32>
    %21 = vector.multi_reduction <maximumf>, %20, %cst_14 [1] : vector<8x8xf32> to vector<8xf32>
    %22 = vector.shape_cast %21 : vector<8xf32> to vector<8x1xf32>
    %23 = vector.broadcast %22 : vector<8x1xf32> to vector<8x8xf32>
    %24 = arith.subf %20, %23 : vector<8x8xf32>
    %25 = math.exp %24 : vector<8x8xf32>
    %cst_15 = arith.constant dense<0.000000e+00> : vector<8xf32>
    %26 = vector.multi_reduction <add>, %25, %cst_15 [1] : vector<8x8xf32> to vector<8xf32>
    %27 = vector.shape_cast %26 : vector<8xf32> to vector<8x1xf32>
    %28 = tpu.reciprocal %27 {approx = true} : vector<8x1xf32> -> vector<8x1xf32>
    %29 = vector.broadcast %28 : vector<8x1xf32> to vector<8x8xf32>
    %30 = arith.mulf %25, %29 : vector<8x8xf32>
    %c0_16 = arith.constant 0 : index
    %c0_17 = arith.constant 0 : index
    %31 = vector.load %arg7[%c0_16, %c0_17] : memref<8x8xf32, #tpu.memory_space<vmem>>, vector<8x8xf32>
    tpu.vector_store %arg7[%c0_16, %c0_17], %30 {strides = array<i32>} : memref<8x8xf32, #tpu.memory_space<vmem>>, vector<8x8xf32>,
    return
  }
  func.func @transform_0(%arg0: i32) -> (i32, i32) {
    %c0_i32 = arith.constant 0 : i32
    %c0_i32_0 = arith.constant 0 : i32
    return %arg0, %c0_i32 : i32, i32
  }
  func.func @transform_1(%arg0: i32) -> (i32, i32) {
    %c0_i32 = arith.constant 0 : i32
    %c0_i32_0 = arith.constant 0 : i32
    return %arg0, %c0_i32 : i32, i32
  }
  func.func @transform_2(%arg0: i32) -> (i32, i32) {
    %c0_i32 = arith.constant 0 : i32
    %c0_i32_0 = arith.constant 0 : i32
    %c0_i32_1 = arith.constant 0 : i32
    return %c0_i32, %c0_i32_0 : i32, i32
  }
  func.func @transform_3(%arg0: i32) -> (i32, i32) {
    %c0_i32 = arith.constant 0 : i32
    %c0_i32_0 = arith.constant 0 : i32
    %c0_i32_1 = arith.constant 0 : i32
    return %c0_i32, %c0_i32_0 : i32, i32
  }
  func.func @transform_4(%arg0: i32) -> (i32, i32) {
    %c0_i32 = arith.constant 0 : i32
    %c0_i32_0 = arith.constant 0 : i32
    %c0_i32_1 = arith.constant 0 : i32
    return %c0_i32, %c0_i32_0 : i32, i32
  }
  func.func @transform_5(%arg0: i32) -> (i32, i32) {
    %c0_i32 = arith.constant 0 : i32
    %c0_i32_0 = arith.constant 0 : i32
    %c0_i32_1 = arith.constant 0 : i32
    return %c0_i32, %c0_i32_0 : i32, i32
  }
  func.func @transform_6(%arg0: i32) -> (i32, i32) {
    %c0_i32 = arith.constant 0 : i32
    %c0_i32_0 = arith.constant 0 : i32
    return %arg0, %c0_i32 : i32, i32
  }
}

module attributes {stable_mosaic.version = 11 : i64} {
  func.func @_classifier_kernel(%arg0: i32, %arg1: memref<8x96xf32, #tpu.memory_space<vmem>>, %arg2: memref<96x64xf32, #tpu.memory_space<vmem>>, %arg3: memref<1x64xf32, #tpu.memory_space<vmem>>, %arg4: memref<64x16xf32, #tpu.memory_space<vmem>>, %arg5: memref<1x16xf32, #tpu.memory_space<vmem>>, %arg6: memref<8x16xf32, #tpu.memory_space<vmem>>) attributes {dimension_semantics = [#tpu.dimension_semantics<parallel>], iteration_bounds = array<i64: 1>, scalar_prefetch = 0 : i64, scratch_operands = 0 : i64, tpu.core_type = #tpu.core_type<tc>, window_params = [{transform_indices = @transform_0, window_bounds = array<i64: 8, 96>}, {pipeline_mode = #tpu.pipeline_mode<synchronous>, transform_indices = @transform_1, window_bounds = array<i64: 96, 64>}, {pipeline_mode = #tpu.pipeline_mode<synchronous>, transform_indices = @transform_2, window_bounds = array<i64: 1, 64>}, {pipeline_mode = #tpu.pipeline_mode<synchronous>, transform_indices = @transform_3, window_bounds = array<i64: 64, 16>}, {pipeline_mode = #tpu.pipeline_mode<synchronous>, transform_indices = @transform_4, window_bounds = array<i64: 1, 16>}, {transform_indices = @transform_5, window_bounds = array<i64: 8, 16>}]} {
    %c0 = arith.constant 0 : index
    %c0_0 = arith.constant 0 : index
    %0 = vector.load %arg1[%c0, %c0_0] : memref<8x96xf32, #tpu.memory_space<vmem>>, vector<8x96xf32>
    %c0_1 = arith.constant 0 : index
    %c0_2 = arith.constant 0 : index
    %1 = vector.load %arg2[%c0_1, %c0_2] : memref<96x64xf32, #tpu.memory_space<vmem>>, vector<96x64xf32>
    %cst = arith.constant dense<0.000000e+00> : vector<8x64xf32>
    %2 = tpu.matmul %0, %1, %cst {dimension_numbers = #tpu.dot_dimension_numbers<[1], [0], [0], [1], [0, 0, 1, 1], [], []>} : vector<8x96xf32>, vector<96x64xf32>, vector<8x64xf32> -> vector<8x64xf32>
    %c0_3 = arith.constant 0 : index
    %c0_4 = arith.constant 0 : index
    %3 = vector.load %arg3[%c0_3, %c0_4] : memref<1x64xf32, #tpu.memory_space<vmem>>, vector<1x64xf32>
    %4 = vector.broadcast %3 : vector<1x64xf32> to vector<8x64xf32>
    %5 = arith.addf %2, %4 : vector<8x64xf32>
    %cst_5 = arith.constant 0.000000e+00 : f32
    %6 = vector.broadcast %cst_5 : f32 to vector<8x64xf32>
    %7 = arith.maximumf %5, %6 : vector<8x64xf32>
    %c0_6 = arith.constant 0 : index
    %c0_7 = arith.constant 0 : index
    %8 = vector.load %arg4[%c0_6, %c0_7] : memref<64x16xf32, #tpu.memory_space<vmem>>, vector<64x16xf32>
    %cst_8 = arith.constant dense<0.000000e+00> : vector<8x16xf32>
    %9 = tpu.matmul %7, %8, %cst_8 {dimension_numbers = #tpu.dot_dimension_numbers<[1], [0], [0], [1], [0, 0, 1, 1], [], []>} : vector<8x64xf32>, vector<64x16xf32>, vector<8x16xf32> -> vector<8x16xf32>
    %c0_9 = arith.constant 0 : index
    %c0_10 = arith.constant 0 : index
    %10 = vector.load %arg5[%c0_9, %c0_10] : memref<1x16xf32, #tpu.memory_space<vmem>>, vector<1x16xf32>
    %11 = vector.broadcast %10 : vector<1x16xf32> to vector<8x16xf32>
    %12 = arith.addf %9, %11 : vector<8x16xf32>
    %c0_11 = arith.constant 0 : index
    %c0_12 = arith.constant 0 : index
    %13 = vector.load %arg6[%c0_11, %c0_12] : memref<8x16xf32, #tpu.memory_space<vmem>>, vector<8x16xf32>
    tpu.vector_store %arg6[%c0_11, %c0_12], %12 {strides = array<i32>} : memref<8x16xf32, #tpu.memory_space<vmem>>, vector<8x16xf32>,
    return
  }
  func.func @transform_0(%arg0: i32) -> (i32, i32) {
    %c0_i32 = arith.constant 0 : i32
    %c0_i32_0 = arith.constant 0 : i32
    return %arg0, %c0_i32 : i32, i32
  }
  func.func @transform_1(%arg0: i32) -> (i32, i32) {
    %c0_i32 = arith.constant 0 : i32
    %c0_i32_0 = arith.constant 0 : i32
    %c0_i32_1 = arith.constant 0 : i32
    return %c0_i32, %c0_i32_0 : i32, i32
  }
  func.func @transform_2(%arg0: i32) -> (i32, i32) {
    %c0_i32 = arith.constant 0 : i32
    %c0_i32_0 = arith.constant 0 : i32
    %c0_i32_1 = arith.constant 0 : i32
    return %c0_i32, %c0_i32_0 : i32, i32
  }
  func.func @transform_3(%arg0: i32) -> (i32, i32) {
    %c0_i32 = arith.constant 0 : i32
    %c0_i32_0 = arith.constant 0 : i32
    %c0_i32_1 = arith.constant 0 : i32
    return %c0_i32, %c0_i32_0 : i32, i32
  }
  func.func @transform_4(%arg0: i32) -> (i32, i32) {
    %c0_i32 = arith.constant 0 : i32
    %c0_i32_0 = arith.constant 0 : i32
    %c0_i32_1 = arith.constant 0 : i32
    return %c0_i32, %c0_i32_0 : i32, i32
  }
  func.func @transform_5(%arg0: i32) -> (i32, i32) {
    %c0_i32 = arith.constant 0 : i32
    %c0_i32_0 = arith.constant 0 : i32
    return %arg0, %c0_i32 : i32, i32
  }
}

</mosaic_0001>

<bundles_post_ra>
// kernel: updown_forward.5
= control target key start
LH: loop header
LB: loop body
LE: loop exit
PB: predicated region body
PF: predicated region fallthrough
CT: control target
= control target key end

     0   :  { %v351_v3 = vmov 0.0|0.0   ;;  %vm352_vm0 = vmmov 0   ;;  %v353_v6 = vmov 0.0   ;;  %s466_s0 = inlined_call_operand.vmem [shape: f32[8,96], index: 0, kind: input, shape index: {}]   ;;  %s467_s1 = inlined_call_operand.vmem [shape: f32[96,64], index: 1, kind: input, shape index: {}]   ;;  %s468_s2 = inlined_call_operand.vmem [shape: f32[1,64], index: 2, kind: input, shape index: {}]   ;;  %s469_s3 = inlined_call_operand.vmem [shape: f32[64,16], index: 3, kind: input, shape index: {}]   ;;  %s470_s4 = inlined_call_operand.vmem [shape: f32[1,16], index: 4, kind: input, shape index: {}]   ;;  %s471_s5 = inlined_call_operand.hbm [shape: f32[8,16], index: 5, kind: output, shape index: {}]  }
   0x1   :  { %v22_v0 = vld [vmem:[%s467_s1] sm:$0xff]  ;;  %v23_v1 = vld [vmem:[%s467_s1 + $0x8] sm:$0xff]  ;;  %v24_v2 = vld [vmem:[%s467_s1 + $0x10] sm:$0xff]  ;;  %293 = vmatprep.subr.bf16.mxu0 %v351_v3  ;;  %271 = vmatprep.mubr.msk.f32.mxu0 %vm352_vm0, %v353_v6 }
   0x2   :  { %v294_v4 = vpack.c.bf16 %v23_v1, %v22_v0  ;;  %v25_v5 = vld [vmem:[%s467_s1 + $0x18] sm:$0xff]  ;;  %311 = vmatprep.subr.bf16.mxu1 %v351_v3  ;;  %290 = vmatprep.mubr.msk.f32.mxu1 %vm352_vm0, %v353_v6  ;;  %v26_v8 = vld [vmem:[%s467_s1 + $0x20] sm:$0xff]  ;;  %v27_v9 = vld [vmem:[%s467_s1 + $0x28] sm:$0xff] }
   0x3   :  { %v297_v7 = vpack.c.bf16 %v25_v5, %v24_v2  ;;  %v116_v10 = vld [vmem:[%s469_s3] sm:$0xff]  ;;  %v117_v11 = vld [vmem:[%s469_s3 + $0x8] sm:$0xff]  ;;  %v118_v13 = vld [vmem:[%s469_s3 + $0x10] sm:$0xff] }
   0x4   :  { %295 = vmatpush3.bf16.msra.mxu0 %v294_v4  ;;  %v312_v12 = vpack.c.bf16 %v117_v11, %v116_v10  ;;  %v119_v14 = vld [vmem:[%s469_s3 + $0x18] sm:$0xff] }
   0x5   :  { %296 = vmatprep.subr.bf16.mxu0 %v351_v3 }
   0x6   :  { %10 = vsyncpa [#allocation3], 0  ;;  %v300_v15 = vpack.c.bf16 %v27_v9, %v26_v8  ;;  %v28_v16 = vld [vmem:[%s467_s1 + $0x30] sm:$0xff]  ;;  %313 = vmatpush3.bf16.msra.mxu1 %v312_v12  ;;  %v315_v17 = vpack.c.bf16 %v119_v14, %v118_v13  ;;  %v29_v18 = vld [vmem:[%s467_s1 + $0x38] sm:$0xff]  ;;  %vm41_vm1 = vcmask 785408   ;;  %vm131_vm2 = vcmask 523264  }
   0x7   :  { %314 = vmatprep.subr.bf16.mxu1 %v351_v3  ;;  %v120_v19 = vld [vmem:[%s469_s3 + $0x20] sm:$0xff]  ;;  %v121_v20 = vld [vmem:[%s469_s3 + $0x28] sm:$0xff]  ;;  %v303_v21 = vpack.c.bf16 %v29_v18, %v28_v16  ;;  %v32_v26 = vld [vmem:[%s467_s1 + $0x50] sm:$0xff]  ;;  %s354_s12 = smov [#allocation2]   ;;  %vm205_vm3 = vcmask 130048  }
   0x8   :  { %298 = vmatpush3.bf16.msra.mxu0 %v297_v7  ;;  %v318_v22 = vpack.c.bf16 %v121_v20, %v120_v19  ;;  %v30_v23 = vld [vmem:[%s467_s1 + $0x40] sm:$0xff]  ;;  %v31_v24 = vld [vmem:[%s467_s1 + $0x48] sm:$0xff]  ;;  %v33_v27 = vld [vmem:[%s467_s1 + $0x58] sm:$0xff]  ;;  %s213_s13 = sshll.u32 %s354_s12, 4  ;;  %s214_s13 = int_to_ptr.vmem [resolvable:$true] %s213_s13 }
   0x9   :  { %299 = vmatprep.subr.bf16.mxu0 %v351_v3  ;;  %v306_v25 = vpack.c.bf16 %v31_v24, %v30_v23  ;;  %v309_v28 = vpack.c.bf16 %v33_v27, %v32_v26  ;;  %v21_v29 = vld [vmem:[%s466_s0] sm:$0xff]  ;;  %v122_v30 = vld [vmem:[%s469_s3 + $0x30] sm:$0xff]  ;;  %v123_v31 = vld [vmem:[%s469_s3 + $0x38] sm:$0xff]  ;;  %s327_s3 = scalar_lea.vmem %s214_s13, 128  ;;  %p332_p1 = scmp.lt.s32.totalorder %s214_s13, %s214_s13 }
   0xa   :  { %316 = vmatpush3.bf16.msra.mxu1 %v315_v17  ;;  %v321_v32 = vpack.c.bf16 %v123_v31, %v122_v30  ;;  %v221_v33 = vld [vmem:[%s468_s2] ss:$0 sm:$0xff]  ;;  %p328_p0 = scmp.ne.s32.totalorder %s214_s13, %s327_s3  ;;  %p333_p2 = scmp.lt.s32.totalorder %s327_s3, %s327_s3 }
   0xb   :  { %317 = vmatprep.subr.bf16.mxu1 %v351_v3  ;;  %v223_v38 = vld [vmem:[%s470_s4] ss:$0 sm:$0xff] }
   0xc   :  { %301 = vmatpush3.bf16.msra.mxu0 %v300_v15  ;;  %p334_p3 = por %p333_p2, %p332_p1 }
   0xd   :  { %302 = vmatprep.subr.bf16.mxu0 %v351_v3 }
   0xe   :  { %319 = vmatpush3.bf16.msra.mxu1 %v318_v22  ;;  %p335_p4 = pnand %p334_p3, %p328_p0 }
   0xf   :  { %320 = vmatprep.subr.bf16.mxu1 %v351_v3 }
  0x10   :  { %304 = vmatpush3.bf16.msra.mxu0 %v303_v21 }
  0x11   :  { %305 = vmatprep.subr.bf16.mxu0 %v351_v3 }
  0x12   :  { %322 = vmatpush3.bf16.msra.mxu1 %v321_v32 }
  0x14   :  { %307 = vmatpush3.bf16.msra.mxu0 %v306_v25 }
  0x15   :  { %308 = vmatprep.subr.bf16.mxu0 %v351_v3 }
  0x18   :  { %310 = vmatpush3.bf16.msra.mxu0 %v309_v28 }
  0x1b   :  { %272 = vmatmul.mubr.msk.f32.vlgmr.msra.gmra.mrb[0].mxu0 %vm41_vm1, %v21_v29 }
  0xee   :  { %v111_v34 = vpop.f32.mrb[0].mxu0 }
  0xef   :  { %v112_v35 = vadd.f32 %v221_v33, %v111_v34  ;;  %v273_v36 = vpop.f32.mrb[1].mxu0 }
  0xf1   :  { %v115_v37 = vmax.f32 %v112_v35, 0.0 }
  0xf3   :  { %291 = vmatmul.mubr.msk.f32.vlgmr.msra.gmra.mrb[0].mxu1 %vm131_vm2, %v115_v37 }
 0x1c6   :  { %v201_v39 = vpop.f32.mrb[0].mxu1 }
 0x1c7   :  { %v202_v40 = vadd.f32 %v223_v38, %v201_v39  ;;  %v292_v41 = vpop.f32.mrb[1].mxu1 }
 0x1c9   :  { %206 = vst.msk [vmem:[#allocation2] sm:$0xff] %vm205_vm3, %v202_v40 }
 0x1ca   :  { %338 = shalt.err (!%p335_p4)
}
 0x1cb   :  { %s339_s15 = scalar_lea.hbm %s471_s5, 128 }
 0x1cc   :  { %p340_p5 = scmp.ne.s32.totalorder %s471_s5, %s339_s15  ;;  %p343_p6 = scmp.lt.u32.totalorder %s339_s15, %s471_s5 }
 0x1ce   :  { %p345_p7 = pnand %p343_p6, %p340_p5 }
 0x1d0   :  { %348 = shalt.err (!%p345_p7)
}
 0x1d1   :  { %216 = dma.vmem_to_hbm [thread:$0]  %s214_s13, 128, %s471_s5, [#allocation3]  }
 0x1d2   :  { %349 = dma.done.wait [#allocation3], 128  }
 0x1d3   :  { %350 = vsyncadd [#allocation3], 4294967168 }
 0x1d4   :  { %220 = vsyncpa [#allocation3], 1 }

// kernel: updown_forward.3
= control target key start
LH: loop header
LB: loop body
LE: loop exit
PB: predicated region body
PF: predicated region fallthrough
CT: control target
= control target key end

     0   :  { %v2003_v3 = vmov 0   ;;  %vm148_vm0 = vcmask 261120   ;;  %vm1635_vm1 = vcmask 1041409   ;;  %vm1637_vm2 = vcmask 1042434   ;;  %s2832_s2 = inlined_call_operand.vmem [shape: bf16[32,1024], index: 2, kind: input, shape index: {}]   ;;  %s2833_s1 = inlined_call_operand.vmem [shape: bf16[64,32], index: 1, kind: input, shape index: {}]   ;;  %s2834_s3 = inlined_call_operand.vmem [shape: bf16[32,1024], index: 3, kind: input, shape index: {}]   ;;  %s2835_s0 = inlined_call_operand.vmem [shape: bf16[8,32], index: 0, kind: input, shape index: {}]   ;;  %s2836_s4 = inlined_call_operand.vmem [shape: f32[1,1024], index: 4, kind: input, shape index: {}]   ;;  %s2837_s5 = inlined_call_operand.vmem [shape: f32[1,1024], index: 5, kind: input, shape index: {}]   ;;  %s2838_s6 = inlined_call_operand.vmem [shape: f32[8,8], index: 6, kind: output, shape index: {}]  }
   0x1   :  { %v32_v0 = vld [vmem:[%s2832_s2] sm:$0xff]  ;;  %v33_v2 = vld [vmem:[%s2832_s2 + $0x8] sm:$0xff]  ;;  %193 = vmatprep.mubr.bf16.mxu0 %v2003_v3  ;;  %266 = vmatprep.mubr.bf16.mxu1 %v2003_v3  ;;  %v34_v15 = vld [vmem:[%s2832_s2 + $0x10] sm:$0xff]  ;;  %vm1639_vm3 = vcmask 1043459   ;;  %vm1641_vm4 = vcmask 1044484   ;;  %vm1643_vm5 = vcmask 1045509  }
   0x2   :  { %v36_v1 = vld [vmem:[%s2832_s2 + $0x20] sm:$0xff]  ;;  %v37_v5 = vld [vmem:[%s2832_s2 + $0x28] sm:$0xff]  ;;  %1980 = vset.pattern.permute.xlu0 %v2003_v3  ;;  %1979 = vset.pattern.permute.xlu1 %v2003_v3  ;;  %v38_v17 = vld [vmem:[%s2832_s2 + $0x30] sm:$0xff]  ;;  %vm1645_vm6 = vcmask 1046534   ;;  %vm1647_vm7 = vcmask 1047559   ;;  %vm1650_vm8 = vcmask 64512  }
   0x3   :  { %v1926_v4 = vcombine.high %v32_v0, %v36_v1  ;;  %v1925_v6 = vcombine.low %v32_v0, %v36_v1  ;;  %v40_v7 = vld [vmem:[%s2832_s2 + $0x40] sm:$0xff]  ;;  %v1928_v9 = vcombine.high %v33_v2, %v37_v5  ;;  %v1927_v10 = vcombine.low %v33_v2, %v37_v5  ;;  %v41_v12 = vld [vmem:[%s2832_s2 + $0x48] sm:$0xff]  ;;  %v35_v18 = vld [vmem:[%s2832_s2 + $0x18] sm:$0xff] }
   0x4   :  { %v44_v8 = vld [vmem:[%s2832_s2 + $0x60] sm:$0xff]  ;;  %v45_v13 = vld [vmem:[%s2832_s2 + $0x68] sm:$0xff]  ;;  %v39_v19 = vld [vmem:[%s2832_s2 + $0x38] sm:$0xff]  ;;  %v1930_v21 = vcombine.high %v34_v15, %v38_v17  ;;  %v1929_v27 = vcombine.low %v34_v15, %v38_v17 }
   0x5   :  { %v1934_v11 = vcombine.high %v40_v7, %v44_v8  ;;  %161 = vmatprep.subr.bf16.mxu0 %v1926_v4  ;;  %v1936_v14 = vcombine.high %v41_v12, %v45_v13  ;;  %234 = vmatprep.subr.bf16.mxu1 %v1928_v9  ;;  %v1933_v16 = vcombine.low %v40_v7, %v44_v8  ;;  %v2083_v22 = vld [vmem:[%s2833_s1] sm:$0xff]   ;;  %v42_v24 = vld [vmem:[%s2832_s2 + $0x50] sm:$0xff]  ;;  %v43_v26 = vld [vmem:[%s2832_s2 + $0x58] sm:$0xff]  ;;  %v736_v7 = vlaneseq }
   0x6   :  { %162 = vmatpush1.bf16.msra.mxu0 %v1925_v6  ;;  %235 = vmatpush1.bf16.msra.mxu1 %v1927_v10  ;;  %v1935_v20 = vcombine.low %v41_v12, %v45_v13  ;;  %v1932_v23 = vcombine.high %v35_v18, %v39_v19  ;;  %v46_v25 = vld [vmem:[%s2832_s2 + $0x70] sm:$0xff]  ;;  %v47_v28 = vld [vmem:[%s2832_s2 + $0x78] sm:$0xff]  ;;  %v1931_v29 = vcombine.low %v35_v18, %v39_v19  ;;  %v454_v31 = vld [vmem:[%s2834_s3] sm:$0xff] }
   0x7   :  { %163 = vmatprep.subr.bf16.mxu0 %v1934_v11  ;;  %236 = vmatprep.subr.bf16.mxu1 %v1936_v14  ;;  %v1938_v30 = vcombine.high %v42_v24, %v46_v25  ;;  %v458_v32 = vld [vmem:[%s2834_s3 + $0x20] sm:$0xff]  ;;  %v1940_v33 = vcombine.high %v43_v26, %v47_v28  ;;  %v455_v34 = vld [vmem:[%s2834_s3 + $0x8] sm:$0xff]  ;;  %v1937_v36 = vcombine.low %v42_v24, %v46_v25  ;;  %v1983_v41 = vld [vmem:[%s2833_s1 + $0x10] sm:$0xff]   ;;  %v2199_v8 = vshrl.u32 %v736_v7, 7 }
   0x8   :  { %v459_v35 = vld [vmem:[%s2834_s3 + $0x28] sm:$0xff]  ;;  %v1939_v37 = vcombine.low %v43_v26, %v47_v28  ;;  %v1958_v38 = vcombine.high %v454_v31, %v458_v32  ;;  %v1984_v42 = vld [vmem:[%s2833_s1 + $0x18] sm:$0xff]   ;;  %v462_v43 = vld [vmem:[%s2834_s3 + $0x40] sm:$0xff]  ;;  %v1957_v45 = vcombine.low %v454_v31, %v458_v32  ;;  %v1602_v9 = vand.u32 127, %v736_v7 }
   0x9   :  { %v1960_v39 = vcombine.high %v455_v34, %v459_v35  ;;  %v1982_v40 = vld [vmem:[%s2833_s1 + $0x8] sm:$0xff]   ;;  %v466_v44 = vld [vmem:[%s2834_s3 + $0x60] sm:$0xff]  ;;  %v1959_v48 = vcombine.low %v455_v34, %v459_v35  ;;  %v456_v50 = vld [vmem:[%s2834_s3 + $0x10] sm:$0xff] }
   0xa   :  { %164 = vmatpush1.bf16.msra.mxu0 %v1933_v16  ;;  %237 = vmatpush1.bf16.msra.mxu1 %v1935_v20  ;;  %v463_v46 = vld [vmem:[%s2834_s3 + $0x48] sm:$0xff]  ;;  %v1966_v49 = vcombine.high %v462_v43, %v466_v44  ;;  %v460_v51 = vld [vmem:[%s2834_s3 + $0x30] sm:$0xff]  ;;  %v457_v53 = vld [vmem:[%s2834_s3 + $0x18] sm:$0xff]  ;;  %v1965_v55 = vcombine.low %v462_v43, %v466_v44  ;;  %v2202_v10 = vsub.s32 %v1602_v9, %v2199_v8 }
   0xb   :  { %307 = vmatprep.subr.bf16.mxu0 %v1930_v21  ;;  %380 = vmatprep.subr.bf16.mxu1 %v1932_v23  ;;  %v467_v47 = vld [vmem:[%s2834_s3 + $0x68] sm:$0xff]  ;;  %v461_v54 = vld [vmem:[%s2834_s3 + $0x38] sm:$0xff]  ;;  %v1962_v57 = vcombine.high %v456_v50, %v460_v51  ;;  %v464_v59 = vld [vmem:[%s2834_s3 + $0x50] sm:$0xff]  ;;  %v1961_v0 = vcombine.low %v456_v50, %v460_v51 }
   0xc   :  { %v1968_v52 = vcombine.high %v463_v46, %v467_v47  ;;  %v1967_v56 = vcombine.low %v463_v46, %v467_v47  ;;  %v1964_v58 = vcombine.high %v457_v53, %v461_v54  ;;  %v468_v60 = vld [vmem:[%s2834_s3 + $0x70] sm:$0xff]  ;;  %v465_v61 = vld [vmem:[%s2834_s3 + $0x58] sm:$0xff]  ;;  %v453_v63 = vld [vmem:[%s2835_s0] sm:$0xf]  ;;  %v1963_v1 = vcombine.low %v457_v53, %v461_v54  ;;  %2845 = vst [vmem:[#allocation2_spill] sm:$0xff] %v2202_v10 }
   0xd   :  { %1941 = vmatmul.mubr.msk.bf16.vlgmr.msra.gmra.mrb[0].mxu0 %vm148_vm0, %v2083_v22  ;;  %1945 = vmatmul.mubr.msk.bf16.vlgmr.msra.gmra.mrb[0].mxu1 %vm148_vm0, %v2083_v22  ;;  %v469_v62 = vld [vmem:[%s2834_s3 + $0x78] sm:$0xff]  ;;  %v1970_v2 = vcombine.high %v464_v59, %v468_v60  ;;  %v1969_v5 = vcombine.low %v464_v59, %v468_v60 }
   0xe   :  { %308 = vmatpush1.bf16.msra.mxu0 %v1929_v27  ;;  %381 = vmatpush1.bf16.msra.mxu1 %v1931_v29  ;;  %v1972_v4 = vcombine.high %v465_v61, %v469_v62  ;;  %v1971_v6 = vcombine.low %v465_v61, %v469_v62 }
   0xf   :  { %203 = vmatprep.mubr.bf16.mxu0 %v2003_v3  ;;  %276 = vmatprep.mubr.bf16.mxu1 %v2003_v3 }
  0x10   :  { %309 = vmatprep.subr.bf16.mxu0 %v1938_v30  ;;  %382 = vmatprep.subr.bf16.mxu1 %v1940_v33 }
  0x12   :  { %310 = vmatpush1.bf16.msra.mxu0 %v1937_v36  ;;  %383 = vmatpush1.bf16.msra.mxu1 %v1939_v37 }
  0x13   :  { %553 = vmatprep.subr.bf16.mxu0 %v1958_v38  ;;  %594 = vmatprep.subr.bf16.mxu1 %v1960_v39 }
  0x15   :  { %1942 = vmatmul.mubr.msk.bf16.gmra.mrb[4].mxu0 %vm148_vm0, %v1982_v40  ;;  %1946 = vmatmul.mubr.msk.bf16.gmra.mrb[4].mxu1 %vm148_vm0, %v1982_v40 }
  0x16   :  { %213 = vmatprep.mubr.bf16.mxu0 %v2003_v3  ;;  %286 = vmatprep.mubr.bf16.mxu1 %v2003_v3 }
  0x1d   :  { %1943 = vmatmul.mubr.msk.bf16.gmra.mrb[8].mxu0 %vm148_vm0, %v1983_v41  ;;  %1947 = vmatmul.mubr.msk.bf16.gmra.mrb[8].mxu1 %vm148_vm0, %v1983_v41 }
  0x1e   :  { %223 = vmatprep.mubr.bf16.mxu0 %v2003_v3  ;;  %296 = vmatprep.mubr.bf16.mxu1 %v2003_v3 }
  0x25   :  { %1944 = vmatmul.mubr.msk.bf16.gmra.mrb[12].mxu0 %vm148_vm0, %v1984_v42  ;;  %1948 = vmatmul.mubr.msk.bf16.gmra.mrb[12].mxu1 %vm148_vm0, %v1984_v42 }
  0x26   :  { %339 = vmatprep.mubr.bf16.mxu0 %v2003_v3  ;;  %412 = vmatprep.mubr.bf16.mxu1 %v2003_v3 }
  0x2d   :  { %1949 = vmatmul.mubr.msk.bf16.vlgmr.msra.gmra.mrb[16].mxu0 %vm148_vm0, %v2083_v22  ;;  %1953 = vmatmul.mubr.msk.bf16.vlgmr.msra.gmra.mrb[16].mxu1 %vm148_vm0, %v2083_v22 }
  0x2e   :  { %554 = vmatpush1.bf16.msra.mxu0 %v1957_v45  ;;  %595 = vmatpush1.bf16.msra.mxu1 %v1959_v48 }
  0x2f   :  { %349 = vmatprep.mubr.bf16.mxu0 %v2003_v3  ;;  %422 = vmatprep.mubr.bf16.mxu1 %v2003_v3 }
  0x30   :  { %555 = vmatprep.subr.bf16.mxu0 %v1966_v49  ;;  %596 = vmatprep.subr.bf16.mxu1 %v1968_v52 }
  0x32   :  { %556 = vmatpush1.bf16.msra.mxu0 %v1965_v55  ;;  %597 = vmatpush1.bf16.msra.mxu1 %v1967_v56 }
  0x33   :  { %635 = vmatprep.subr.bf16.mxu0 %v1962_v57  ;;  %676 = vmatprep.subr.bf16.mxu1 %v1964_v58 }
  0x35   :  { %1950 = vmatmul.mubr.msk.bf16.gmra.mrb[20].mxu0 %vm148_vm0, %v1982_v40  ;;  %1954 = vmatmul.mubr.msk.bf16.gmra.mrb[20].mxu1 %vm148_vm0, %v1982_v40 }
  0x36   :  { %359 = vmatprep.mubr.bf16.mxu0 %v2003_v3  ;;  %432 = vmatprep.mubr.bf16.mxu1 %v2003_v3 }
  0x3d   :  { %1951 = vmatmul.mubr.msk.bf16.gmra.mrb[24].mxu0 %vm148_vm0, %v1983_v41  ;;  %1955 = vmatmul.mubr.msk.bf16.gmra.mrb[24].mxu1 %vm148_vm0, %v1983_v41 }
  0x3e   :  { %369 = vmatprep.mubr.bf16.mxu0 %v2003_v3  ;;  %442 = vmatprep.mubr.bf16.mxu1 %v2003_v3 }
  0x45   :  { %1952 = vmatmul.mubr.msk.bf16.gmra.mrb[28].mxu0 %vm148_vm0, %v1984_v42  ;;  %1956 = vmatmul.mubr.msk.bf16.gmra.mrb[28].mxu1 %vm148_vm0, %v1984_v42 }
  0x46   :  { %585 = vmatprep.mubr.bf16.mxu0 %v2003_v3  ;;  %626 = vmatprep.mubr.bf16.mxu1 %v2003_v3 }
  0x4d   :  { %1973 = vmatmul.mubr.msk.bf16.vlgmr.msra.gmra.mrb[32].mxu0 %vm148_vm0, %v453_v63  ;;  %1974 = vmatmul.mubr.msk.bf16.vlgmr.msra.gmra.mrb[32].mxu1 %vm148_vm0, %v453_v63 }
  0x4e   :  { %636 = vmatpush1.bf16.msra.mxu0 %v1961_v0  ;;  %677 = vmatpush1.bf16.msra.mxu1 %v1963_v1 }
  0x4f   :  { %637 = vmatprep.subr.bf16.mxu0 %v1970_v2  ;;  %678 = vmatprep.subr.bf16.mxu1 %v1972_v4  ;;  %v2004_v4 = vmov 1966171168  }
  0x50   :  { %667 = vmatprep.mubr.bf16.mxu0 %v2003_v3  ;;  %708 = vmatprep.mubr.bf16.mxu1 %v2003_v3 }
  0x52   :  { %638 = vmatpush1.bf16.msra.mxu0 %v1969_v5  ;;  %679 = vmatpush1.bf16.msra.mxu1 %v1971_v6  ;;  %v734_v5 = vunpack.c.l.s4 %v2004_v4 }
  0x55   :  { %1975 = vmatmul.mubr.msk.bf16.vlgmr.msra.gmra.mrb[36].mxu0 %vm148_vm0, %v453_v63  ;;  %1976 = vmatmul.mubr.msk.bf16.vlgmr.msra.gmra.mrb[36].mxu1 %vm148_vm0, %v453_v63 }
  0xe0   :  { %v2204_v11 = vpop.f32.mrb[0].mxu0  ;;  %v2206_v12 = vpop.f32.mrb[0].mxu1 }
  0xe1   :  { %v2208_v13 = vpop.f32.mrb[1].mxu0  ;;  %v2210_v3 = vpop.f32.mrb[1].mxu1 }
  0xe2   :  { %v2212_v14 = vpop.f32.mrb[2].mxu0  ;;  %v2214_v15 = vpop.f32.mrb[2].mxu1 }
  0xe3   :  { %2846 = vst [vmem:[#allocation3_spill] sm:$0xff] %v2212_v14  ;;  %2847 = vst [vmem:[#allocation4_spill] sm:$0xff] %v2214_v15  ;;  %v2216_v16 = vpop.f32.mrb[3].mxu0  ;;  %v2218_v17 = vpop.f32.mrb[3].mxu1 }
  0xe4   :  { %2848 = vst [vmem:[#allocation5_spill] sm:$0xff] %v2216_v16  ;;  %2849 = vst [vmem:[#allocation6_spill] sm:$0xff] %v2218_v17 }
  0xe8   :  { %v2220_v18 = vpop.f32.mrb[4].mxu0  ;;  %v2222_v19 = vpop.f32.mrb[4].mxu1 }
  0xe9   :  { %v2224_v20 = vpop.f32.mrb[5].mxu0  ;;  %v2226_v21 = vpop.f32.mrb[5].mxu1 }
  0xea   :  { %v2228_v22 = vpop.f32.mrb[6].mxu0  ;;  %v2230_v23 = vpop.f32.mrb[6].mxu1 }
  0xeb   :  { %v2232_v24 = vpop.f32.mrb[7].mxu0  ;;  %v2234_v25 = vpop.f32.mrb[7].mxu1 }
  0xf0   :  { %v2236_v26 = vpop.f32.mrb[8].mxu0  ;;  %v2238_v27 = vpop.f32.mrb[8].mxu1 }
  0xf1   :  { %2850 = vst [vmem:[#allocation7_spill] sm:$0xff] %v2236_v26  ;;  %2851 = vst [vmem:[#allocation8_spill] sm:$0xff] %v2238_v27  ;;  %v2240_v28 = vpop.f32.mrb[9].mxu0  ;;  %v2242_v29 = vpop.f32.mrb[9].mxu1 }
  0xf2   :  { %2852 = vst [vmem:[#allocation9_spill] sm:$0xff] %v2240_v28  ;;  %2853 = vst [vmem:[#allocation10_spill] sm:$0xff] %v2242_v29  ;;  %v2244_v30 = vpop.f32.mrb[10].mxu0  ;;  %v2246_v31 = vpop.f32.mrb[10].mxu1 }
  0xf3   :  { %2854 = vst [vmem:[#allocation11_spill] sm:$0xff] %v2244_v30  ;;  %2855 = vst [vmem:[#allocation12_spill] sm:$0xff] %v2246_v31  ;;  %v2248_v32 = vpop.f32.mrb[11].mxu0  ;;  %v2250_v33 = vpop.f32.mrb[11].mxu1 }
  0xf4   :  { %2856 = vst [vmem:[#allocation13_spill] sm:$0xff] %v2248_v32  ;;  %2857 = vst [vmem:[#allocation14_spill] sm:$0xff] %v2250_v33 }
  0xf8   :  { %v2252_v34 = vpop.f32.mrb[12].mxu0  ;;  %v2254_v35 = vpop.f32.mrb[12].mxu1 }
  0xf9   :  { %2858 = vst [vmem:[#allocation15_spill] sm:$0xff] %v2252_v34  ;;  %2859 = vst [vmem:[#allocation16_spill] sm:$0xff] %v2254_v35  ;;  %v2256_v36 = vpop.f32.mrb[13].mxu0  ;;  %v2258_v37 = vpop.f32.mrb[13].mxu1  ;;  %v735_v34 = vunpack.c.0.s8 %v734_v5 }
  0xfa   :  { %2860 = vst [vmem:[#allocation17_spill] sm:$0xff] %v2256_v36  ;;  %2861 = vst [vmem:[#allocation18_spill] sm:$0xff] %v2258_v37  ;;  %v2260_v38 = vpop.f32.mrb[14].mxu0  ;;  %v2262_v39 = vpop.f32.mrb[14].mxu1 }
  0xfb   :  { %2862 = vst [vmem:[#allocation19_spill] sm:$0xff] %v2260_v38  ;;  %2863 = vst [vmem:[#allocation20_spill] sm:$0xff] %v2262_v39  ;;  %v2264_v40 = vpop.f32.mrb[15].mxu0  ;;  %v2266_v41 = vpop.f32.mrb[15].mxu1 }
  0xfc   :  { %2864 = vst [vmem:[#allocation21_spill] sm:$0xff] %v2264_v40  ;;  %2865 = vst [vmem:[#allocation22_spill] sm:$0xff] %v2266_v41 }
 0x100   :  { %v2268_v42 = vpop.f32.mrb[16].mxu0  ;;  %v2270_v43 = vpop.f32.mrb[16].mxu1 }
 0x101   :  { %v2272_v44 = vpop.f32.mrb[17].mxu0  ;;  %v2274_v45 = vpop.f32.mrb[17].mxu1 }
 0x102   :  { %v2276_v46 = vpop.f32.mrb[18].mxu0  ;;  %v2278_v47 = vpop.f32.mrb[18].mxu1 }
 0x103   :  { %2866 = vst [vmem:[#allocation23_spill] sm:$0xff] %v2276_v46  ;;  %2867 = vst [vmem:[#allocation24_spill] sm:$0xff] %v2278_v47  ;;  %v2280_v48 = vpop.f32.mrb[19].mxu0  ;;  %v2282_v49 = vpop.f32.mrb[19].mxu1 }
 0x104   :  { %2868 = vst [vmem:[#allocation25_spill] sm:$0xff] %v2280_v48  ;;  %2869 = vst [vmem:[#allocation26_spill] sm:$0xff] %v2282_v49 }
 0x108   :  { %v2284_v50 = vpop.f32.mrb[20].mxu0  ;;  %v2286_v51 = vpop.f32.mrb[20].mxu1 }
 0x109   :  { %v2288_v52 = vpop.f32.mrb[21].mxu0  ;;  %v2290_v53 = vpop.f32.mrb[21].mxu1 }
 0x10a   :  { %v2292_v54 = vpop.f32.mrb[22].mxu0  ;;  %v2294_v55 = vpop.f32.mrb[22].mxu1 }
 0x10b   :  { %2870 = vst [vmem:[#allocation27_spill] sm:$0xff] %v2292_v54  ;;  %2871 = vst [vmem:[#allocation28_spill] sm:$0xff] %v2294_v55  ;;  %v2296_v56 = vpop.f32.mrb[23].mxu0  ;;  %v2298_v57 = vpop.f32.mrb[23].mxu1 }
 0x10c   :  { %2872 = vst [vmem:[#allocation29_spill] sm:$0xff] %v2296_v56  ;;  %2873 = vst [vmem:[#allocation30_spill] sm:$0xff] %v2298_v57 }
 0x110   :  { %v2300_v58 = vpop.f32.mrb[24].mxu0  ;;  %v2302_v59 = vpop.f32.mrb[24].mxu1 }
 0x111   :  { %2874 = vst [vmem:[#allocation31_spill] sm:$0xff] %v2300_v58  ;;  %2875 = vst [vmem:[#allocation32_spill] sm:$0xff] %v2302_v59  ;;  %v2304_v60 = vpop.f32.mrb[25].mxu0  ;;  %v2306_v61 = vpop.f32.mrb[25].mxu1 }
 0x112   :  { %2876 = vst [vmem:[#allocation33_spill] sm:$0xff] %v2304_v60  ;;  %2877 = vst [vmem:[#allocation34_spill] sm:$0xff] %v2306_v61  ;;  %v2308_v62 = vpop.f32.mrb[26].mxu0  ;;  %v2310_v63 = vpop.f32.mrb[26].mxu1 }
 0x113   :  { %2878 = vst [vmem:[#allocation35_spill] sm:$0xff] %v2308_v62  ;;  %2879 = vst [vmem:[#allocation36_spill] sm:$0xff] %v2310_v63  ;;  %v2312_v0 = vpop.f32.mrb[27].mxu0  ;;  %v2314_v1 = vpop.f32.mrb[27].mxu1 }
 0x114   :  { %2880 = vst [vmem:[#allocation37_spill] sm:$0xff] %v2312_v0  ;;  %2881 = vst [vmem:[#allocation38_spill] sm:$0xff] %v2314_v1 }
 0x118   :  { %v2316_v2 = vpop.f32.mrb[28].mxu0  ;;  %v2318_v6 = vpop.f32.mrb[28].mxu1 }
 0x119   :  { %2882 = vst [vmem:[#allocation39_spill] sm:$0xff] %v2316_v2  ;;  %2883 = vst [vmem:[#allocation40_spill] sm:$0xff] %v2318_v6  ;;  %v2320_v7 = vpop.f32.mrb[29].mxu0  ;;  %v2322_v9 = vpop.f32.mrb[29].mxu1  ;;  %v2333_v2 = vsub.s32 %v735_v34, %v2199_v8 }
 0x11a   :  { %2884 = vst [vmem:[#allocation41_spill] sm:$0xff] %v2320_v7  ;;  %2885 = vst [vmem:[#allocation42_spill] sm:$0xff] %v2322_v9  ;;  %v2324_v10 = vpop.f32.mrb[30].mxu0  ;;  %v2326_v37 = vpop.f32.mrb[30].mxu1 }
 0x11b   :  { %2886 = vst [vmem:[#allocation43_spill] sm:$0xff] %v2324_v10  ;;  %2887 = vst [vmem:[#allocation44_spill] sm:$0xff] %v2326_v37  ;;  %v2328_v35 = vpop.f32.mrb[31].mxu0  ;;  %v2330_v36 = vpop.f32.mrb[31].mxu1 }
 0x11c   :  { %2888 = vst [vmem:[#allocation45_spill] sm:$0xff] %v2328_v35  ;;  %2889 = vst [vmem:[#allocation46_spill] sm:$0xff] %v2330_v36 }
 0x120   :  { %v587_v41 = vpop.f32.mrb[32].mxu0  ;;  %v628_v4 = vpop.f32.mrb[32].mxu1 }
 0x121   :  { %v589_v39 = vpop.f32.mrb[33].mxu0  ;;  %v630_v7 = vpop.f32.mrb[33].mxu1 }
 0x122   :  { %v725_v6 = vcombine.low %v587_v41, %v589_v39  ;;  %v726_v40 = vcombine.high %v587_v41, %v589_v39  ;;  %v591_v38 = vpop.f32.mrb[34].mxu0  ;;  %v727_v9 = vcombine.low %v628_v4, %v630_v7  ;;  %v728_v61 = vcombine.high %v628_v4, %v630_v7  ;;  %v632_v10 = vpop.f32.mrb[34].mxu1 }
 0x123   :  { %v592_v59 = vpop.f32.mrb[35].mxu0  ;;  %v633_v36 = vpop.f32.mrb[35].mxu1  ;;  %v1245_v38 = vld [vmem:[%s2836_s4] sm:$0xff]  ;;  %v2343_v10 = vsub.s32 0, %v2199_v8  ;;  %v2346_v41 = vsub.s32 1, %v2199_v8 }
 0x124   :  { %v739_v37 = vrot.slane %v725_v6, %v2333_v2  ;;  %v746_v35 = vrot.slane %v726_v40, %v2333_v2  ;;  %v753_v5 = vrot.slane %v727_v9, %v2333_v2  ;;  %v760_v34 = vrot.slane %v728_v61, %v2333_v2 }
 0x125   :  { %v2349_v36 = vsub.s32 2, %v2199_v8  ;;  %v2358_v61 = vsub.s32 5, %v2199_v8  ;;  %v2361_v6 = vsub.s32 6, %v2199_v8  ;;  %v2367_v28 = vrot.slane %v1245_v38, %v2343_v10 }
 0x126   :  { %v789_v60 = vcombine.low %v739_v37, %v753_v5  ;;  %v790_v58 = vcombine.high %v739_v37, %v753_v5  ;;  %v791_v29 = vcombine.low %v746_v35, %v760_v34  ;;  %v792_v27 = vcombine.high %v746_v35, %v760_v34 }
 0x127   :  { %v2352_v37 = vsub.s32 3, %v2199_v8  ;;  %v2355_v35 = vsub.s32 4, %v2199_v8  ;;  %v2364_v34 = vsub.s32 7, %v2199_v8  ;;  %v2370_v62 = vrot.slane %v1245_v38, %v2346_v41 }
 0x128   :  { %v669_v39 = vpop.f32.mrb[36].mxu0  ;;  %v710_v40 = vpop.f32.mrb[36].mxu1  ;;  %v2373_v33 = vrot.slane %v1245_v38, %v2349_v36  ;;  %v2391_v31 = vrot.slane %v1245_v38, %v2358_v61  ;;  %v2394_v32 = vrot.slane %v1245_v38, %v2361_v6  ;;  %v803_v48 = vrot.slane %v789_v60, %v2333_v2 }
 0x129   :  { %v671_v59 = vpop.f32.mrb[37].mxu0  ;;  %v712_v4 = vpop.f32.mrb[37].mxu1  ;;  %v817_v60 = vrot.slane %v790_v58, %v2333_v2 }
 0x12a   :  { %v729_v7 = vcombine.low %v669_v39, %v671_v59  ;;  %v730_v9 = vcombine.high %v669_v39, %v671_v59  ;;  %v673_v5 = vpop.f32.mrb[38].mxu0  ;;  %v731_v26 = vcombine.low %v710_v40, %v712_v4  ;;  %v732_v1 = vcombine.high %v710_v40, %v712_v4  ;;  %v714_v63 = vpop.f32.mrb[38].mxu1  ;;  %v2378_v39 = vld [vmem:[%s2837_s5] sm:$0xff] }
 0x12b   :  { %v674_v0 = vpop.f32.mrb[39].mxu0  ;;  %v715_v5 = vpop.f32.mrb[39].mxu1  ;;  %v2383_v40 = vrot.slane %v1245_v38, %v2352_v37  ;;  %v2386_v63 = vrot.slane %v1245_v38, %v2355_v35  ;;  %v2415_v46 = vrot.slane %v2378_v39, %v2352_v37  ;;  %v2419_v17 = vrot.slane %v2378_v39, %v2355_v35 }
 0x12c   :  { %v767_v8 = vrot.slane %v729_v7, %v2333_v2  ;;  %v774_v59 = vrot.slane %v730_v9, %v2333_v2  ;;  %v781_v0 = vrot.slane %v731_v26, %v2333_v2  ;;  %v788_v4 = vrot.slane %v732_v1, %v2333_v2 }
 0x12d   :  { %v2397_v7 = vrot.slane %v1245_v38, %v2364_v34  ;;  %v2401_v9 = vrot.slane %v2378_v39, %v2343_v10  ;;  %v2405_v5 = vrot.slane %v2378_v39, %v2346_v41  ;;  %v2409_v26 = vrot.slane %v2378_v39, %v2349_v36 }
 0x12e   :  { %v793_v1 = vcombine.low %v767_v8, %v781_v0  ;;  %v794_v30 = vcombine.high %v767_v8, %v781_v0  ;;  %v795_v49 = vcombine.low %v774_v59, %v788_v4  ;;  %v796_v47 = vcombine.high %v774_v59, %v788_v4 }
 0x12f   :  { %v810_v38 = vrot.slane %v791_v29, %v2333_v2  ;;  %v824_v29 = vrot.slane %v792_v27, %v2333_v2  ;;  %v2429_v0 = vrot.slane %v2378_v39, %v2358_v61  ;;  %v2433_v4 = vrot.slane %v2378_v39, %v2361_v6 }
 0x130   :  { %v831_v15 = vrot.slane %v793_v1, %v2333_v2  ;;  %v838_v16 = vrot.slane %v795_v49, %v2333_v2  ;;  %v845_v8 = vrot.slane %v794_v30, %v2333_v2  ;;  %v852_v59 = vrot.slane %v796_v47, %v2333_v2 }
 0x132   :  { %v2435_v14 = vcombine.low %v803_v48, %v831_v15  ;;  %v854_v1 = vcombine.high %v803_v48, %v831_v15  ;;  %v2437_v49 = vcombine.low %v810_v38, %v838_v16  ;;  %v2439_v30 = vcombine.high %v810_v38, %v838_v16 }
 0x133   :  { %v2441_v47 = vcombine.low %v817_v60, %v845_v8  ;;  %v2443_v58 = vcombine.high %v817_v60, %v845_v8  ;;  %v2445_v27 = vcombine.low %v824_v29, %v852_v59  ;;  %v2447_v2 = vcombine.high %v824_v29, %v852_v59 }
 0x134   :  { %2890 = vst [vmem:[#allocation47_spill] sm:$0xff] %v2437_v49  ;;  %2891 = vst [vmem:[#allocation48_spill] sm:$0xff] %v2439_v30  ;;  %v928_v57 = vrot.slane %v854_v1, %v2343_v10  ;;  %v932_v55 = vrot.slane %v854_v1, %v2346_v41  ;;  %v936_v56 = vrot.slane %v854_v1, %v2349_v36 }
 0x135   :  { %2892 = vst [vmem:[#allocation49_spill] sm:$0xff] %v2441_v47  ;;  %2893 = vst [vmem:[#allocation50_spill] sm:$0xff] %v2445_v27  ;;  %v940_v15 = vrot.slane %v854_v1, %v2352_v37  ;;  %v944_v48 = vrot.slane %v854_v1, %v2355_v35  ;;  %v948_v16 = vrot.slane %v854_v1, %v2358_v61 }
 0x136   :  { %2894 = vst [vmem:[#allocation51_spill] sm:$0xff] %v2447_v2  ;;  %v952_v38 = vrot.slane %v854_v1, %v2361_v6  ;;  %v956_v8 = vrot.slane %v854_v1, %v2364_v34  ;;  %v1197_v60 = vadd.f32 %v928_v57, %v2220_v18  ;;  %v1198_v59 = vadd.f32 %v932_v55, %v2224_v20 }
 0x137   :  { %v1199_v29 = vadd.f32 %v936_v56, %v2222_v19  ;;  %v1200_v30 = vadd.f32 %v940_v15, %v2226_v21  ;;  %v1201_v2 = vadd.f32 %v944_v48, %v2284_v50  ;;  %v1202_v49 = vadd.f32 %v948_v16, %v2288_v52 }
 0x138   :  { %v1203_v27 = vadd.f32 %v952_v38, %v2286_v51  ;;  %v1204_v47 = vadd.f32 %v956_v8, %v2290_v53  ;;  %v1303_v54 = vadd.f32 %v2367_v28, %v1197_v60  ;;  %v1304_v1 = vadd.f32 %v2370_v62, %v1198_v59 }
 0x139   :  { %v1305_v18 = vadd.f32 %v2373_v33, %v1199_v29  ;;  %v1306_v20 = vadd.f32 %v2383_v40, %v1200_v30  ;;  %v1307_v19 = vadd.f32 %v2386_v63, %v1201_v2  ;;  %v1308_v21 = vadd.f32 %v2391_v31, %v1202_v49 }
 0x13a   :  { %v1309_v50 = vadd.f32 %v2394_v32, %v1203_v27  ;;  %v1310_v52 = vadd.f32 %v2397_v7, %v1204_v47  ;;  %v1367_v55 = vmax.f32 %v1303_v54, 0.0  ;;  %v1368_v51 = vmax.f32 %v1304_v1, 0.0 }
 0x13b   :  { %v1369_v56 = vmax.f32 %v1305_v18, 0.0  ;;  %v1370_v53 = vmax.f32 %v1306_v20, 0.0  ;;  %v1371_v57 = vmax.f32 %v1307_v19, 0.0  ;;  %v1372_v15 = vmax.f32 %v1308_v21, 0.0 }
 0x13c   :  { %v1373_v48 = vmax.f32 %v1309_v50, 0.0  ;;  %v2475_v16 = vrot.slane %v2378_v39, %v2364_v34  ;;  %v1374_v30 = vmax.f32 %v1310_v52, 0.0  ;;  %v1473_v2 = vmul.f32 %v2401_v9, %v1367_v55 }
 0x13d   :  { %v1474_v49 = vmul.f32 %v2405_v5, %v1368_v51  ;;  %v1475_v27 = vmul.f32 %v2409_v26, %v1369_v56  ;;  %v1476_v47 = vmul.f32 %v2415_v46, %v1370_v53  ;;  %v1477_v54 = vmul.f32 %v2419_v17, %v1371_v57 }
 0x13e   :  { %v1478_v38 = vmul.f32 %v2429_v0, %v1372_v15  ;;  %v1479_v8 = vmul.f32 %v2433_v4, %v1373_v48  ;;  %v864_v39 = vrot.slane %v2435_v14, %v2343_v10  ;;  %v868_v59 = vrot.slane %v2435_v14, %v2346_v41 }
 0x13f   :  { %v1539_v60 = vadd.f32 %v1474_v49, %v1473_v2  ;;  %v872_v29 = vrot.slane %v2435_v14, %v2349_v36  ;;  %v876_v1 = vrot.slane %v2435_v14, %v2352_v37  ;;  %v880_v18 = vrot.slane %v2435_v14, %v2355_v35 }
 0x140   :  { %v884_v20 = vrot.slane %v2435_v14, %v2358_v61  ;;  %v888_v19 = vrot.slane %v2435_v14, %v2361_v6  ;;  %v892_v50 = vrot.slane %v2435_v14, %v2364_v34  ;;  %v1181_v52 = vadd.f32 %v864_v39, %v2204_v11 }
 0x141   :  { %v1540_v21 = vadd.f32 %v1539_v60, %v1475_v27  ;;  %v1182_v55 = vadd.f32 %v868_v59, %v2208_v13  ;;  %v1183_v51 = vadd.f32 %v872_v29, %v2206_v12  ;;  %v1184_v56 = vadd.f32 %v876_v1, %v2210_v3 }
 0x142   :  { %v1185_v53 = vadd.f32 %v880_v18, %v2268_v42  ;;  %v1186_v57 = vadd.f32 %v884_v20, %v2272_v44  ;;  %v1187_v48 = vadd.f32 %v888_v19, %v2270_v43  ;;  %v1188_v2 = vadd.f32 %v892_v50, %v2274_v45 }
 0x143   :  { %v1541_v15 = vadd.f32 %v1540_v21, %v1476_v47  ;;  %v1287_v49 = vadd.f32 %v2367_v28, %v1181_v52  ;;  %v1288_v14 = vadd.f32 %v2370_v62, %v1182_v55  ;;  %v1289_v11 = vadd.f32 %v2373_v33, %v1183_v51 }
 0x144   :  { %v1290_v13 = vadd.f32 %v2383_v40, %v1184_v56  ;;  %v1291_v12 = vadd.f32 %v2386_v63, %v1185_v53  ;;  %v1292_v42 = vadd.f32 %v2391_v31, %v1186_v57  ;;  %v1293_v44 = vadd.f32 %v2394_v32, %v1187_v48 }
 0x145   :  { %v1542_v3 = vadd.f32 %v1541_v15, %v1477_v54  ;;  %v1294_v27 = vadd.f32 %v2397_v7, %v1188_v2  ;;  %v1351_v43 = vmax.f32 %v1287_v49, 0.0  ;;  %v1352_v47 = vmax.f32 %v1288_v14, 0.0 }
 0x146   :  { %v1353_v45 = vmax.f32 %v1289_v11, 0.0  ;;  %v1354_v60 = vmax.f32 %v1290_v13, 0.0  ;;  %v1355_v59 = vmax.f32 %v1291_v12, 0.0  ;;  %v1356_v29 = vmax.f32 %v1292_v42, 0.0 }
 0x147   :  { %v1543_v39 = vadd.f32 %v1542_v3, %v1478_v38  ;;  %v1357_v1 = vmax.f32 %v1293_v44, 0.0  ;;  %v1480_v18 = vmul.f32 %v2475_v16, %v1374_v30  ;;  %v1358_v20 = vmax.f32 %v1294_v27, 0.0  ;;  %v2895_v27 = vld [vmem:[#allocation27_spill] sm:$0xff] }
 0x148   :  { %v1457_v19 = vmul.f32 %v2401_v9, %v1351_v43  ;;  %v1458_v54 = vmul.f32 %v2405_v5, %v1352_v47  ;;  %v1459_v50 = vmul.f32 %v2409_v26, %v1353_v45  ;;  %v1460_v52 = vmul.f32 %v2415_v46, %v1354_v60  ;;  %v2896_v47 = vld [vmem:[#allocation29_spill] sm:$0xff]  ;;  %v2897_v60 = vld [vmem:[#allocation28_spill] sm:$0xff] }
 0x149   :  { %v1544_v21 = vadd.f32 %v1543_v39, %v1479_v8  ;;  %v1461_v55 = vmul.f32 %v2419_v17, %v1355_v59  ;;  %v1462_v51 = vmul.f32 %v2429_v0, %v1356_v29  ;;  %v1463_v38 = vmul.f32 %v2433_v4, %v1357_v1  ;;  %v2898_v59 = vld [vmem:[#allocation30_spill] sm:$0xff] }
 0x14a   :  { %v1521_v56 = vadd.f32 %v1458_v54, %v1457_v19  ;;  %v960_v30 = vrot.slane %v2443_v58, %v2343_v10  ;;  %v964_v57 = vrot.slane %v2443_v58, %v2346_v41  ;;  %v968_v8 = vrot.slane %v2443_v58, %v2349_v36 }
 0x14b   :  { %v1545_v53 = vadd.f32 %v1544_v21, %v1480_v18  ;;  %v972_v15 = vrot.slane %v2443_v58, %v2352_v37  ;;  %v976_v2 = vrot.slane %v2443_v58, %v2355_v35  ;;  %v980_v49 = vrot.slane %v2443_v58, %v2358_v61 }
 0x14c   :  { %v1522_v48 = vadd.f32 %v1521_v56, %v1459_v50  ;;  %v984_v14 = vrot.slane %v2443_v58, %v2361_v6  ;;  %v988_v11 = vrot.slane %v2443_v58, %v2364_v34  ;;  %v1205_v13 = vadd.f32 %v960_v30, %v2228_v22 }
 0x14d   :  { %1546 = vadd.xlane.f32.xlu1 %v1545_v53  ;;  %v1206_v12 = vadd.f32 %v964_v57, %v2232_v24  ;;  %v1207_v3 = vadd.f32 %v968_v8, %v2230_v23  ;;  %v1208_v44 = vadd.f32 %v972_v15, %v2234_v25  ;;  %v1209_v43 = vadd.f32 %v976_v2, %v2895_v27 }
 0x14e   :  { %v1523_v42 = vadd.f32 %v1522_v48, %v1460_v52  ;;  %v1210_v45 = vadd.f32 %v980_v49, %v2896_v47  ;;  %v1211_v39 = vadd.f32 %v984_v14, %v2897_v60  ;;  %v1212_v29 = vadd.f32 %v988_v11, %v2898_v59 }
 0x14f   :  { %v1311_v1 = vadd.f32 %v2367_v28, %v1205_v13  ;;  %v1312_v58 = vadd.f32 %v2370_v62, %v1206_v12  ;;  %v1313_v24 = vadd.f32 %v2373_v33, %v1207_v3  ;;  %v1314_v23 = vadd.f32 %v2383_v40, %v1208_v44 }
 0x150   :  { %v1524_v22 = vadd.f32 %v1523_v42, %v1461_v55  ;;  %v1315_v18 = vadd.f32 %v2386_v63, %v1209_v43  ;;  %v1316_v25 = vadd.f32 %v2391_v31, %v1210_v45  ;;  %v1317_v19 = vadd.f32 %v2394_v32, %v1211_v39  ;;  %v2899_v42 = vld [vmem:[#allocation49_spill] sm:$0xff] }
 0x151   :  { %v1318_v54 = vadd.f32 %v2397_v7, %v1212_v29  ;;  %v1375_v21 = vmax.f32 %v1311_v1, 0.0  ;;  %v1376_v52 = vmax.f32 %v1312_v58, 0.0  ;;  %v1377_v56 = vmax.f32 %v1313_v24, 0.0  ;;  %v2900_v29 = vld [vmem:[#allocation3_spill] sm:$0xff]  ;;  %v2901_v58 = vld [vmem:[#allocation5_spill] sm:$0xff]  ;;  %v2902_v24 = vld [vmem:[#allocation4_spill] sm:$0xff] }
 0x152   :  { %v1525_v50 = vadd.f32 %v1524_v22, %v1462_v51  ;;  %v1378_v30 = vmax.f32 %v1314_v23, 0.0  ;;  %v1464_v53 = vmul.f32 %v2475_v16, %v1358_v20  ;;  %v1379_v55 = vmax.f32 %v1315_v18, 0.0  ;;  %v2903_v18 = vld [vmem:[#allocation6_spill] sm:$0xff] }
 0x153   :  { %v1380_v57 = vmax.f32 %v1316_v25, 0.0  ;;  %v1381_v8 = vmax.f32 %v1317_v19, 0.0  ;;  %v1382_v48 = vmax.f32 %v1318_v54, 0.0  ;;  %v1481_v2 = vmul.f32 %v2401_v9, %v1375_v21  ;;  %v2904_v54 = vld [vmem:[#allocation23_spill] sm:$0xff] }
 0x154   :  { %v1526_v15 = vadd.f32 %v1525_v50, %v1463_v38  ;;  %v1482_v49 = vmul.f32 %v2405_v5, %v1376_v52  ;;  %v1483_v14 = vmul.f32 %v2409_v26, %v1377_v56  ;;  %v1484_v11 = vmul.f32 %v2415_v46, %v1378_v30  ;;  %v2905_v50 = vld [vmem:[#allocation25_spill] sm:$0xff]  ;;  %v2906_v56 = vld [vmem:[#allocation24_spill] sm:$0xff] }
 0x155   :  { %v1485_v51 = vmul.f32 %v2419_v17, %v1379_v55  ;;  %v1486_v13 = vmul.f32 %v2429_v0, %v1380_v57  ;;  %v1487_v20 = vmul.f32 %v2433_v4, %v1381_v8  ;;  %v896_v38 = vrot.slane %v2899_v42, %v2343_v10 }
 0x156   :  { %v1527_v12 = vadd.f32 %v1526_v15, %v1464_v53  ;;  %v1548_v3 = vadd.f32 %v1482_v49, %v1481_v2  ;;  %v900_v44 = vrot.slane %v2899_v42, %v2346_v41  ;;  %v904_v27 = vrot.slane %v2899_v42, %v2349_v36  ;;  %v2907_v53 = vld [vmem:[#allocation26_spill] sm:$0xff] }
 0x157   :  { %v908_v43 = vrot.slane %v2899_v42, %v2352_v37  ;;  %v912_v47 = vrot.slane %v2899_v42, %v2355_v35  ;;  %v916_v60 = vrot.slane %v2899_v42, %v2358_v61  ;;  %v920_v39 = vrot.slane %v2899_v42, %v2361_v6 }
 0x158   :  { %1528 = vadd.xlane.f32.xlu0 %v1527_v12  ;;  %v1549_v45 = vadd.f32 %v1548_v3, %v1483_v14  ;;  %v924_v59 = vrot.slane %v2899_v42, %v2364_v34  ;;  %v1189_v1 = vadd.f32 %v896_v38, %v2900_v29  ;;  %v1190_v22 = vadd.f32 %v900_v44, %v2901_v58 }
 0x159   :  { %v1191_v23 = vadd.f32 %v904_v27, %v2902_v24  ;;  %v1192_v25 = vadd.f32 %v908_v43, %v2903_v18  ;;  %v1193_v21 = vadd.f32 %v912_v47, %v2904_v54  ;;  %v1194_v52 = vadd.f32 %v916_v60, %v2905_v50 }
 0x15a   :  { %v1550_v19 = vadd.f32 %v1549_v45, %v1484_v11  ;;  %v1195_v30 = vadd.f32 %v920_v39, %v2906_v56  ;;  %v1196_v55 = vadd.f32 %v924_v59, %v2907_v53  ;;  %v1295_v57 = vadd.f32 %v2367_v28, %v1189_v1 }
 0x15b   :  { %v1296_v8 = vadd.f32 %v2370_v62, %v1190_v22  ;;  %v1297_v15 = vadd.f32 %v2373_v33, %v1191_v23  ;;  %v1298_v49 = vadd.f32 %v2383_v40, %v1192_v25  ;;  %v1299_v14 = vadd.f32 %v2386_v63, %v1193_v21  ;;  %v2908_v25 = vld [vmem:[#allocation50_spill] sm:$0xff] }
 0x15c   :  { %v1551_v2 = vadd.f32 %v1550_v19, %v1485_v51  ;;  %v1300_v11 = vadd.f32 %v2391_v31, %v1194_v52  ;;  %v1301_v12 = vadd.f32 %v2394_v32, %v1195_v30  ;;  %v1302_v3 = vadd.f32 %v2397_v7, %v1196_v55  ;;  %v2909_v55 = vld [vmem:[#allocation11_spill] sm:$0xff] }
 0x15d   :  { %v1359_v42 = vmax.f32 %v1295_v57, 0.0  ;;  %v1360_v38 = vmax.f32 %v1296_v8, 0.0  ;;  %v1361_v27 = vmax.f32 %v1297_v15, 0.0  ;;  %v1362_v43 = vmax.f32 %v1298_v49, 0.0  ;;  %v2910_v8 = vld [vmem:[#allocation13_spill] sm:$0xff] }
 0x15e   :  { %v1552_v44 = vadd.f32 %v1551_v2, %v1486_v13  ;;  %v1363_v47 = vmax.f32 %v1299_v14, 0.0  ;;  %v1488_v45 = vmul.f32 %v2475_v16, %v1382_v48  ;;  %v1364_v60 = vmax.f32 %v1300_v11, 0.0  ;;  %v2911_v2 = vld [vmem:[#allocation12_spill] sm:$0xff]  ;;  %v2912_v14 = vld [vmem:[#allocation14_spill] sm:$0xff] }
 0x15f   :  { %v1365_v51 = vmax.f32 %v1301_v12, 0.0  ;;  %v1465_v39 = vmul.f32 %v2401_v9, %v1359_v42  ;;  %v1366_v29 = vmax.f32 %v1302_v3, 0.0  ;;  %v1466_v1 = vmul.f32 %v2405_v5, %v1360_v38  ;;  %v2913_v12 = vld [vmem:[#allocation35_spill] sm:$0xff]  ;;  %v2914_v38 = vld [vmem:[#allocation37_spill] sm:$0xff] }
 0x160   :  { %v1553_v59 = vadd.f32 %v1552_v44, %v1487_v20  ;;  %v1467_v58 = vmul.f32 %v2409_v26, %v1361_v27  ;;  %v1468_v22 = vmul.f32 %v2415_v46, %v1362_v43  ;;  %v1469_v24 = vmul.f32 %v2419_v17, %v1363_v47  ;;  %v2915_v27 = vld [vmem:[#allocation36_spill] sm:$0xff]  ;;  %v2916_v47 = vld [vmem:[#allocation38_spill] sm:$0xff] }
 0x161   :  { %v1470_v13 = vmul.f32 %v2429_v0, %v1364_v60  ;;  %v1471_v23 = vmul.f32 %v2433_v4, %v1365_v51  ;;  %v1530_v48 = vadd.f32 %v1466_v1, %v1465_v39  ;;  %v1024_v19 = vrot.slane %v2908_v25, %v2343_v10 }
 0x162   :  { %v1554_v18 = vadd.f32 %v1553_v59, %v1488_v45  ;;  %v1028_v20 = vrot.slane %v2908_v25, %v2346_v41  ;;  %v1032_v54 = vrot.slane %v2908_v25, %v2349_v36  ;;  %v1036_v21 = vrot.slane %v2908_v25, %v2352_v37 }
 0x163   :  { %v1040_v50 = vrot.slane %v2908_v25, %v2355_v35  ;;  %v1044_v52 = vrot.slane %v2908_v25, %v2358_v61  ;;  %v1531_v56 = vadd.f32 %v1530_v48, %v1467_v58  ;;  %v1048_v30 = vrot.slane %v2908_v25, %v2361_v6 }
 0x164   :  { %1555 = vadd.xlane.f32.xlu1 %v1554_v18  ;;  %v1052_v53 = vrot.slane %v2908_v25, %v2364_v34  ;;  %v1221_v57 = vadd.f32 %v1024_v19, %v2909_v55  ;;  %v1222_v15 = vadd.f32 %v1028_v20, %v2910_v8  ;;  %v1223_v49 = vadd.f32 %v1032_v54, %v2911_v2 }
 0x165   :  { %v1224_v11 = vadd.f32 %v1036_v21, %v2912_v14  ;;  %v1225_v3 = vadd.f32 %v1040_v50, %v2913_v12  ;;  %v1532_v42 = vadd.f32 %v1531_v56, %v1468_v22  ;;  %v1226_v44 = vadd.f32 %v1044_v52, %v2914_v38 }
 0x166   :  { %v1227_v43 = vadd.f32 %v1048_v30, %v2915_v27  ;;  %v1228_v45 = vadd.f32 %v1052_v53, %v2916_v47  ;;  %v1327_v60 = vadd.f32 %v2367_v28, %v1221_v57  ;;  %v1328_v51 = vadd.f32 %v2370_v62, %v1222_v15 }
 0x167   :  { %v1329_v39 = vadd.f32 %v2373_v33, %v1223_v49  ;;  %v1330_v59 = vadd.f32 %v2383_v40, %v1224_v11  ;;  %v1533_v1 = vadd.f32 %v1532_v42, %v1469_v24  ;;  %v1331_v58 = vadd.f32 %v2386_v63, %v1225_v3 }
 0x168   :  { %v1332_v18 = vadd.f32 %v2391_v31, %v1226_v44  ;;  %v1333_v22 = vadd.f32 %v2394_v32, %v1227_v43  ;;  %v1334_v48 = vadd.f32 %v2397_v7, %v1228_v45  ;;  %v1391_v25 = vmax.f32 %v1327_v60, 0.0  ;;  %v2918_v45 = vld [vmem:[#allocation7_spill] sm:$0xff] }
 0x169   :  { %v1392_v19 = vmax.f32 %v1328_v51, 0.0  ;;  %v1393_v20 = vmax.f32 %v1329_v39, 0.0  ;;  %v1534_v54 = vadd.f32 %v1533_v1, %v1470_v13  ;;  %v1394_v21 = vmax.f32 %v1330_v59, 0.0  ;;  %v2919_v51 = vld [vmem:[#allocation9_spill] sm:$0xff]  ;;  %v2920_v1 = vld [vmem:[#allocation8_spill] sm:$0xff] }
 0x16a   :  { %v1395_v50 = vmax.f32 %v1331_v58, 0.0  ;;  %v1396_v52 = vmax.f32 %v1332_v18, 0.0  ;;  %v1472_v56 = vmul.f32 %v2475_v16, %v1366_v29  ;;  %v1397_v30 = vmax.f32 %v1333_v22, 0.0  ;;  %v2917_v29 = vld [vmem:[#allocation47_spill] sm:$0xff]  ;;  %v2921_v18 = vld [vmem:[#allocation10_spill] sm:$0xff] }
 0x16b   :  { %v1497_v24 = vmul.f32 %v2401_v9, %v1391_v25  ;;  %v1498_v53 = vmul.f32 %v2405_v5, %v1392_v19  ;;  %v1535_v55 = vadd.f32 %v1534_v54, %v1471_v23  ;;  %v1398_v57 = vmax.f32 %v1334_v48, 0.0  ;;  %v2922_v48 = vld [vmem:[#allocation31_spill] sm:$0xff]  ;;  %v2923_v19 = vld [vmem:[#allocation33_spill] sm:$0xff]  ;;  %v2924_v54 = vld [vmem:[#allocation32_spill] sm:$0xff] }
 0x16c   :  { %v1499_v8 = vmul.f32 %v2409_v26, %v1393_v20  ;;  %v1500_v15 = vmul.f32 %v2415_v46, %v1394_v21  ;;  %v1501_v2 = vmul.f32 %v2419_v17, %v1395_v50  ;;  %v1502_v13 = vmul.f32 %v2429_v0, %v1396_v52  ;;  %v2925_v50 = vld [vmem:[#allocation34_spill] sm:$0xff] }
 0x16d   :  { %v1503_v49 = vmul.f32 %v2433_v4, %v1397_v30  ;;  %v1566_v14 = vadd.f32 %v1498_v53, %v1497_v24  ;;  %v1536_v11 = vadd.f32 %v1535_v55, %v1472_v56  ;;  %v992_v12 = vrot.slane %v2917_v29, %v2343_v10 }
 0x16e   :  { %v996_v3 = vrot.slane %v2917_v29, %v2346_v41  ;;  %v1000_v23 = vrot.slane %v2917_v29, %v2349_v36  ;;  %v1004_v38 = vrot.slane %v2917_v29, %v2352_v37  ;;  %v1008_v44 = vrot.slane %v2917_v29, %v2355_v35 }
 0x16f   :  { %v1567_v42 = vadd.f32 %v1566_v14, %v1499_v8  ;;  %v1012_v27 = vrot.slane %v2917_v29, %v2358_v61  ;;  %1537 = vadd.xlane.f32.xlu0 %v1536_v11  ;;  %v1016_v43 = vrot.slane %v2917_v29, %v2361_v6  ;;  %v1020_v47 = vrot.slane %v2917_v29, %v2364_v34 }
 0x170   :  { %v1213_v60 = vadd.f32 %v992_v12, %v2918_v45  ;;  %v1214_v39 = vadd.f32 %v996_v3, %v2919_v51  ;;  %v1215_v58 = vadd.f32 %v1000_v23, %v2920_v1  ;;  %v1216_v22 = vadd.f32 %v1004_v38, %v2921_v18 }
 0x171   :  { %v1568_v59 = vadd.f32 %v1567_v42, %v1500_v15  ;;  %v1217_v25 = vadd.f32 %v1008_v44, %v2922_v48  ;;  %v1218_v20 = vadd.f32 %v1012_v27, %v2923_v19  ;;  %v1219_v21 = vadd.f32 %v1016_v43, %v2924_v54 }
 0x172   :  { %v1220_v52 = vadd.f32 %v1020_v47, %v2925_v50  ;;  %v1319_v56 = vadd.f32 %v2367_v28, %v1213_v60  ;;  %v1320_v24 = vadd.f32 %v2370_v62, %v1214_v39  ;;  %v1321_v53 = vadd.f32 %v2373_v33, %v1215_v58 }
 0x173   :  { %v1569_v30 = vadd.f32 %v1568_v59, %v1501_v2  ;;  %v1322_v55 = vadd.f32 %v2383_v40, %v1216_v22  ;;  %v1323_v8 = vadd.f32 %v2386_v63, %v1217_v25  ;;  %v1324_v15 = vadd.f32 %v2391_v31, %v1218_v20 }
 0x174   :  { %v1325_v14 = vadd.f32 %v2394_v32, %v1219_v21  ;;  %v1326_v11 = vadd.f32 %v2397_v7, %v1220_v52  ;;  %v1383_v12 = vmax.f32 %v1319_v56, 0.0  ;;  %v1384_v3 = vmax.f32 %v1320_v24, 0.0  ;;  %v2927_v52 = vld [vmem:[#allocation19_spill] sm:$0xff] }
 0x175   :  { %v1570_v29 = vadd.f32 %v1569_v30, %v1502_v13  ;;  %v1385_v23 = vmax.f32 %v1321_v53, 0.0  ;;  %v1386_v42 = vmax.f32 %v1322_v55, 0.0  ;;  %v1387_v2 = vmax.f32 %v1323_v8, 0.0  ;;  %v2928_v30 = vld [vmem:[#allocation21_spill] sm:$0xff]  ;;  %v2929_v53 = vld [vmem:[#allocation20_spill] sm:$0xff] }
 0x176   :  { %v1388_v38 = vmax.f32 %v1324_v15, 0.0  ;;  %v1389_v44 = vmax.f32 %v1325_v14, 0.0  ;;  %v1504_v27 = vmul.f32 %v2475_v16, %v1398_v57  ;;  %v1489_v47 = vmul.f32 %v2401_v9, %v1383_v12  ;;  %v2926_v57 = vld [vmem:[#allocation51_spill] sm:$0xff]  ;;  %v2930_v15 = vld [vmem:[#allocation22_spill] sm:$0xff]  ;;  %v2932_v12 = vld [vmem:[#allocation45_spill] sm:$0xff] }
 0x177   :  { %v1571_v43 = vadd.f32 %v1570_v29, %v1503_v49  ;;  %v1490_v45 = vmul.f32 %v2405_v5, %v1384_v3  ;;  %v1390_v60 = vmax.f32 %v1326_v11, 0.0  ;;  %v1491_v51 = vmul.f32 %v2409_v26, %v1385_v23  ;;  %v2931_v11 = vld [vmem:[#allocation43_spill] sm:$0xff]  ;;  %v2933_v23 = vld [vmem:[#allocation44_spill] sm:$0xff] }
 0x178   :  { %v1492_v39 = vmul.f32 %v2415_v46, %v1386_v42  ;;  %v1493_v13 = vmul.f32 %v2419_v17, %v1387_v2  ;;  %v1494_v1 = vmul.f32 %v2429_v0, %v1388_v38  ;;  %v1495_v58 = vmul.f32 %v2433_v4, %v1389_v44  ;;  %v2934_v2 = vld [vmem:[#allocation46_spill] sm:$0xff] }
 0x179   :  { %v1572_v59 = vadd.f32 %v1571_v43, %v1504_v27  ;;  %v1557_v18 = vadd.f32 %v1490_v45, %v1489_v47  ;;  %v1088_v49 = vrot.slane %v2926_v57, %v2343_v10  ;;  %v1092_v22 = vrot.slane %v2926_v57, %v2346_v41 }
 0x17a   :  { %v1096_v48 = vrot.slane %v2926_v57, %v2349_v36  ;;  %v1100_v25 = vrot.slane %v2926_v57, %v2352_v37  ;;  %v1104_v20 = vrot.slane %v2926_v57, %v2355_v35  ;;  %v1108_v54 = vrot.slane %v2926_v57, %v2358_v61 }
 0x17b   :  { %1573 = vadd.xlane.f32.xlu1 %v1572_v59  ;;  %v1558_v19 = vadd.f32 %v1557_v18, %v1491_v51  ;;  %v1112_v21 = vrot.slane %v2926_v57, %v2361_v6  ;;  %v1116_v50 = vrot.slane %v2926_v57, %v2364_v34  ;;  %v1237_v56 = vadd.f32 %v1088_v49, %v2927_v52 }
 0x17c   :  { %v1238_v24 = vadd.f32 %v1092_v22, %v2928_v30  ;;  %v1239_v55 = vadd.f32 %v1096_v48, %v2929_v53  ;;  %v1240_v14 = vadd.f32 %v1100_v25, %v2930_v15  ;;  %v1241_v29 = vadd.f32 %v1104_v20, %v2931_v11 }
 0x17d   :  { %v1559_v8 = vadd.f32 %v1558_v19, %v1492_v39  ;;  %v1242_v3 = vadd.f32 %v1108_v54, %v2932_v12  ;;  %v1243_v42 = vadd.f32 %v1112_v21, %v2933_v23  ;;  %v1244_v38 = vadd.f32 %v1116_v50, %v2934_v2 }
 0x17e   :  { %v1343_v44 = vadd.f32 %v2367_v28, %v1237_v56  ;;  %v1344_v27 = vadd.f32 %v2370_v62, %v1238_v24  ;;  %v1345_v47 = vadd.f32 %v2373_v33, %v1239_v55  ;;  %v1346_v45 = vadd.f32 %v2383_v40, %v1240_v14 }
 0x17f   :  { %v1560_v43 = vadd.f32 %v1559_v8, %v1493_v13  ;;  %v1347_v51 = vadd.f32 %v2386_v63, %v1241_v29  ;;  %v1348_v39 = vadd.f32 %v2391_v31, %v1242_v3  ;;  %v1349_v59 = vadd.f32 %v2394_v32, %v1243_v42  ;;  %v2935_v8 = vld [vmem:[#allocation48_spill] sm:$0xff]  ;;  %v2936_v42 = vld [vmem:[#allocation15_spill] sm:$0xff] }
 0x180   :  { %v1350_v18 = vadd.f32 %v2397_v7, %v1244_v38  ;;  %v1407_v57 = vmax.f32 %v1343_v44, 0.0  ;;  %v1408_v22 = vmax.f32 %v1344_v27, 0.0  ;;  %v1409_v48 = vmax.f32 %v1345_v47, 0.0  ;;  %v2937_v38 = vld [vmem:[#allocation17_spill] sm:$0xff]  ;;  %v2938_v27 = vld [vmem:[#allocation16_spill] sm:$0xff]  ;;  %v2939_v47 = vld [vmem:[#allocation18_spill] sm:$0xff] }
 0x181   :  { %v1561_v49 = vadd.f32 %v1560_v43, %v1494_v1  ;;  %v1410_v25 = vmax.f32 %v1346_v45, 0.0  ;;  %v1496_v19 = vmul.f32 %v2475_v16, %v1390_v60  ;;  %v1411_v13 = vmax.f32 %v1347_v51, 0.0 }
 0x182   :  { %v1412_v54 = vmax.f32 %v1348_v39, 0.0  ;;  %v1513_v21 = vmul.f32 %v2401_v9, %v1407_v57  ;;  %v1514_v50 = vmul.f32 %v2405_v5, %v1408_v22  ;;  %v1413_v52 = vmax.f32 %v1349_v59, 0.0  ;;  %v2940_v39 = vld [vmem:[#allocation39_spill] sm:$0xff] }
 0x183   :  { %v1562_v20 = vadd.f32 %v1561_v49, %v1495_v58  ;;  %v1414_v56 = vmax.f32 %v1350_v18, 0.0  ;;  %v1515_v30 = vmul.f32 %v2409_v26, %v1409_v48  ;;  %v1516_v24 = vmul.f32 %v2415_v46, %v1410_v25  ;;  %v2941_v18 = vld [vmem:[#allocation41_spill] sm:$0xff]  ;;  %v2942_v49 = vld [vmem:[#allocation40_spill] sm:$0xff]  ;;  %v2943_v48 = vld [vmem:[#allocation42_spill] sm:$0xff] }
 0x184   :  { %v1517_v1 = vmul.f32 %v2419_v17, %v1411_v13  ;;  %v1584_v55 = vadd.f32 %v1514_v50, %v1513_v21  ;;  %v1056_v60 = vrot.slane %v2935_v8, %v2343_v10  ;;  %v1060_v58 = vrot.slane %v2935_v8, %v2346_v41 }
 0x185   :  { %v1563_v53 = vadd.f32 %v1562_v20, %v1496_v19  ;;  %v1064_v15 = vrot.slane %v2935_v8, %v2349_v36  ;;  %v1068_v14 = vrot.slane %v2935_v8, %v2352_v37  ;;  %v1072_v11 = vrot.slane %v2935_v8, %v2355_v35 }
 0x186   :  { %v1585_v29 = vadd.f32 %v1584_v55, %v1515_v30  ;;  %v1076_v12 = vrot.slane %v2935_v8, %v2358_v61  ;;  %v1080_v3 = vrot.slane %v2935_v8, %v2361_v6  ;;  %v1084_v23 = vrot.slane %v2935_v8, %v2364_v34 }
 0x187   :  { %1564 = vadd.xlane.f32.xlu0 %v1563_v53  ;;  %v1229_v2 = vadd.f32 %v1056_v60, %v2936_v42  ;;  %v1230_v44 = vadd.f32 %v1060_v58, %v2937_v38  ;;  %v1231_v43 = vadd.f32 %v1064_v15, %v2938_v27  ;;  %v1232_v45 = vadd.f32 %v1068_v14, %v2939_v47 }
 0x188   :  { %v1586_v51 = vadd.f32 %v1585_v29, %v1516_v24  ;;  %v1233_v59 = vadd.f32 %v1072_v11, %v2940_v39  ;;  %v1234_v57 = vadd.f32 %v1076_v12, %v2941_v18  ;;  %v1235_v22 = vadd.f32 %v1080_v3, %v2942_v49 }
 0x189   :  { %v1236_v25 = vadd.f32 %v1084_v23, %v2943_v48  ;;  %v1335_v19 = vadd.f32 %v2367_v28, %v1229_v2  ;;  %v1336_v13 = vadd.f32 %v2370_v62, %v1230_v44  ;;  %v1337_v20 = vadd.f32 %v2373_v33, %v1231_v43 }
 0x18a   :  { %v1518_v21 = vmul.f32 %v2429_v0, %v1412_v54  ;;  %v1587_v50 = vadd.f32 %v1586_v51, %v1517_v1  ;;  %v1338_v30 = vadd.f32 %v2383_v40, %v1232_v45  ;;  %v1519_v55 = vmul.f32 %v2433_v4, %v1413_v52  ;;  %v2944_v45 = vld [vmem:[#allocation2_spill] sm:$0xff] }
 0x18b   :  { %v1399_v24 = vmax.f32 %v1335_v19, 0.0  ;;  %v1400_v53 = vmax.f32 %v1336_v13, 0.0  ;;  %v1339_v60 = vadd.f32 %v2386_v63, %v1233_v59  ;;  %v1401_v58 = vmax.f32 %v1337_v20, 0.0 }
 0x18c   :  { %v1588_v8 = vadd.f32 %v1587_v50, %v1518_v21  ;;  %v1520_v15 = vmul.f32 %v2475_v16, %v1414_v56  ;;  %v1340_v33 = vadd.f32 %v2391_v31, %v1234_v57  ;;  %v1402_v14 = vmax.f32 %v1338_v30, 0.0 }
 0x18d   :  { %v1505_v28 = vmul.f32 %v2401_v9, %v1399_v24  ;;  %v1506_v54 = vmul.f32 %v2405_v5, %v1400_v53  ;;  %v1341_v40 = vadd.f32 %v2394_v32, %v1235_v22  ;;  %v1403_v11 = vmax.f32 %v1339_v60, 0.0 }
 0x18e   :  { %v1589_v62 = vadd.f32 %v1588_v8, %v1519_v55  ;;  %v1507_v52 = vmul.f32 %v2409_v26, %v1401_v58  ;;  %v1342_v63 = vadd.f32 %v2397_v7, %v1236_v25  ;;  %v1404_v12 = vmax.f32 %v1340_v33, 0.0 }
 0x18f   :  { %v1575_v29 = vadd.f32 %v1506_v54, %v1505_v28  ;;  %v1508_v56 = vmul.f32 %v2415_v46, %v1402_v14  ;;  %v1405_v3 = vmax.f32 %v1341_v40, 0.0  ;;  %v1509_v31 = vmul.f32 %v2419_v17, %v1403_v11 }
 0x190   :  { %v1590_v1 = vadd.f32 %v1589_v62, %v1520_v15  ;;  %v1406_v42 = vmax.f32 %v1342_v63, 0.0  ;;  %v1510_v5 = vmul.f32 %v2429_v0, %v1404_v12 }
 0x191   :  { %v1576_v9 = vadd.f32 %v1575_v29, %v1507_v52  ;;  %v1511_v2 = vmul.f32 %v2433_v4, %v1405_v3 }
 0x192   :  { %1591 = vadd.xlane.f32.xlu1 %v1590_v1  ;;  %v1512_v26 = vmul.f32 %v2475_v16, %v1406_v42 }
 0x193   :  { %v1577_v23 = vadd.f32 %v1576_v9, %v1508_v56 }
 0x195   :  { %v1578_v32 = vadd.f32 %v1577_v23, %v1509_v31 }
 0x197   :  { %v1579_v38 = vadd.f32 %v1578_v32, %v1510_v5 }
 0x199   :  { %v1580_v44 = vadd.f32 %v1579_v38, %v1511_v2 }
 0x19b   :  { %v1581_v27 = vadd.f32 %v1580_v44, %v1512_v26 }
 0x19d   :  { %1582 = vadd.xlane.f32.xlu0 %v1581_v27 }
 0x1da   :  { %v1547_v43 = vpop.xlane.xlu1 %1546 }
 0x1db   :  { %v1614_v4 = vrot.slane %v1547_v43, %v2944_v45 }
 0x1e5   :  { %v1529_v7 = vpop.xlane.xlu0 %1528 }
 0x1e6   :  { %v1606_v17 = vrot.slane %v1529_v7, %v2944_v45 }
 0x1f1   :  { %v1556_v47 = vpop.xlane.xlu1 %1555 }
 0x1f2   :  { %v1618_v18 = vrot.slane %v1556_v47, %v2944_v45 }
 0x1fc   :  { %v1538_v46 = vpop.xlane.xlu0 %1537 }
 0x1fd   :  { %v1610_v51 = vrot.slane %v1538_v46, %v2944_v45 }
 0x1ff   :  { %v1636_v0 = vsel %vm1635_vm1, %v1610_v51, %v1606_v17 }
 0x200   :  { %v1638_v16 = vsel %vm1637_vm2, %v1614_v4, %v1636_v0 }
 0x201   :  { %v1640_v49 = vsel %vm1639_vm3, %v1618_v18, %v1638_v16 }
 0x208   :  { %v1574_v39 = vpop.xlane.xlu1 %1573 }
 0x209   :  { %v1626_v48 = vrot.slane %v1574_v39, %v2944_v45 }
 0x214   :  { %v1565_v59 = vpop.xlane.xlu0 %1564 }
 0x215   :  { %v1622_v57 = vrot.slane %v1565_v59, %v2944_v45 }
 0x217   :  { %v1642_v25 = vsel %vm1641_vm4, %v1622_v57, %v1640_v49 }
 0x218   :  { %v1644_v21 = vsel %vm1643_vm5, %v1626_v48, %v1642_v25 }
 0x21f   :  { %v1592_v22 = vpop.xlane.xlu1 %1591 }
 0x220   :  { %v1634_v19 = vrot.slane %v1592_v22, %v2944_v45 }
 0x22a   :  { %v1583_v13 = vpop.xlane.xlu0 %1582 }
 0x22b   :  { %v1630_v20 = vrot.slane %v1583_v13, %v2944_v45 }
 0x22d   :  { %v1646_v50 = vsel %vm1645_vm6, %v1630_v20, %v1644_v21 }
 0x22e   :  { %v1648_v30 = vsel %vm1647_vm7, %v1634_v19, %v1646_v50 }
 0x22f   :  { %v1651_v24 = vsel %vm1650_vm8, %v1648_v30, -inf }
 0x230   :  { %1652 = vmax.xlane.f32.xlu0 %v1651_v24 }
 0x2bd   :  { %v1653_v53 = vpop.xlane.xlu0 %1652 }
 0x2be   :  { %v1658_v55 = vrot.slane %v1653_v53, %v2343_v10  ;;  %v1662_v8 = vrot.slane %v1653_v53, %v2346_v41  ;;  %v1666_v60 = vrot.slane %v1653_v53, %v2349_v36  ;;  %v1670_v58 = vrot.slane %v1653_v53, %v2352_v37 }
 0x2bf   :  { %v1674_v54 = vrot.slane %v1653_v53, %v2355_v35  ;;  %v1678_v11 = vrot.slane %v1653_v53, %v2358_v61  ;;  %v1682_v63 = vrot.slane %v1653_v53, %v2361_v6  ;;  %v1686_v31 = vrot.slane %v1653_v53, %v2364_v34 }
 0x2c0   :  { %v1695_v15 = vsub.f32 %v1529_v7, %v1658_v55  ;;  %v1696_v28 = vsub.f32 %v1538_v46, %v1662_v8  ;;  %v1697_v62 = vsub.f32 %v1547_v43, %v1666_v60  ;;  %v1698_v40 = vsub.f32 %v1556_v47, %v1670_v58 }
 0x2c1   :  { %v1699_v52 = vsub.f32 %v1565_v59, %v1674_v54  ;;  %v1700_v12 = vsub.f32 %v1574_v39, %v1678_v11  ;;  %v1701_v23 = vsub.f32 %v1583_v13, %v1682_v63  ;;  %v1702_v32 = vsub.f32 %v1592_v22, %v1686_v31 }
 0x2c2   :  { %v1703_v33 = vmul.f32 1.442695, %v1695_v15  ;;  %v1705_v14 = vmul.f32 1.442695, %v1696_v28  ;;  %v1707_v1 = vmul.f32 1.442695, %v1697_v62 }
 0x2c3   :  { %v1709_v29 = vmul.f32 1.442695, %v1698_v40  ;;  %v1711_v56 = vmul.f32 1.442695, %v1699_v52  ;;  %v1713_v42 = vmul.f32 1.442695, %v1700_v12 }
 0x2c4   :  { %1985 = vpow2.f32 %v1703_v33  ;;  %v1715_v2 = vmul.f32 1.442695, %v1701_v23  ;;  %v1717_v26 = vmul.f32 1.442695, %v1702_v32 }
 0x2c5   :  { %1987 = vpow2.f32 %v1705_v14 }
 0x2c6   :  { %1989 = vpow2.f32 %v1707_v1 }
 0x2c7   :  { %1991 = vpow2.f32 %v1709_v29 }
 0x2c8   :  { %1993 = vpow2.f32 %v1711_v56 }
 0x2c9   :  { %1995 = vpow2.f32 %v1713_v42 }
 0x2ca   :  { %1997 = vpow2.f32 %v1715_v2 }
 0x2cb   :  { %1999 = vpow2.f32 %v1717_v26 }
 0x2ce   :  { %v1986_v9 = vpop.eup %1985 }
 0x2cf   :  { %v1988_v3 = vpop.eup %1987  ;;  %1728 = vperm.xlu1 %1979, %v1986_v9  }
 0x2d0   :  { %1731 = vperm.xlu0 %1980, %v1988_v3   ;;  %v1990_v5 = vpop.eup %1989 }
 0x2d1   :  { %v1992_v38 = vpop.eup %1991 }
 0x2d2   :  { %v1994_v44 = vpop.eup %1993 }
 0x2d3   :  { %1734 = vperm.xlu1 %1979, %v1990_v5   ;;  %v1996_v27 = vpop.eup %1995 }
 0x2d4   :  { %v1998_v7 = vpop.eup %1997 }
 0x2d5   :  { %v2000_v43 = vpop.eup %1999 }
 0x2d7   :  { %1737 = vperm.xlu1 %1979, %v1992_v38  }
 0x2db   :  { %1740 = vperm.xlu1 %1979, %v1994_v44  }
 0x2df   :  { %1743 = vperm.xlu1 %1979, %v1996_v27  }
 0x2e3   :  { %1746 = vperm.xlu1 %1979, %v1998_v7  }
 0x2e7   :  { %1749 = vperm.xlu1 %1979, %v2000_v43  }
 0x34e   :  { %v1729_v46 = vpop.permute.xlu1 %1728 }
 0x34f   :  { %v1732_v0 = vpop.permute.xlu0 %1731  ;;  %v1754_v59 = vrot.slane %v1729_v46, %v2944_v45 }
 0x350   :  { %v1758_v39 = vrot.slane %v1732_v0, %v2944_v45 }
 0x352   :  { %v1735_v47 = vpop.permute.xlu1 %1734  ;;  %v1783_v22 = vsel %vm1635_vm1, %v1758_v39, %v1754_v59 }
 0x353   :  { %v1762_v16 = vrot.slane %v1735_v47, %v2944_v45 }
 0x355   :  { %v1784_v25 = vsel %vm1637_vm2, %v1762_v16, %v1783_v22 }
 0x356   :  { %v1738_v51 = vpop.permute.xlu1 %1737 }
 0x357   :  { %v1766_v18 = vrot.slane %v1738_v51, %v2944_v45 }
 0x359   :  { %v1785_v13 = vsel %vm1639_vm3, %v1766_v18, %v1784_v25 }
 0x35a   :  { %v1741_v17 = vpop.permute.xlu1 %1740 }
 0x35b   :  { %v1770_v57 = vrot.slane %v1741_v17, %v2944_v45 }
 0x35d   :  { %v1786_v20 = vsel %vm1641_vm4, %v1770_v57, %v1785_v13 }
 0x35e   :  { %v1744_v4 = vpop.permute.xlu1 %1743 }
 0x35f   :  { %v1774_v48 = vrot.slane %v1744_v4, %v2944_v45 }
 0x361   :  { %v1787_v50 = vsel %vm1643_vm5, %v1774_v48, %v1786_v20 }
 0x362   :  { %v1747_v49 = vpop.permute.xlu1 %1746 }
 0x363   :  { %v1778_v19 = vrot.slane %v1747_v49, %v2944_v45 }
 0x365   :  { %v1788_v24 = vsel %vm1645_vm6, %v1778_v19, %v1787_v50 }
 0x366   :  { %v1750_v21 = vpop.permute.xlu1 %1749 }
 0x367   :  { %v1782_v30 = vrot.slane %v1750_v21, %v2944_v45 }
 0x369   :  { %v1789_v53 = vsel %vm1647_vm7, %v1782_v30, %v1788_v24 }
 0x36a   :  { %v1791_v55 = vsel %vm1650_vm8, %v1789_v53, 0.0 }
 0x36b   :  { %1792 = vadd.xlane.f32.xlu1 %v1791_v55 }
 0x3f8   :  { %v1793_v8 = vpop.xlane.xlu1 %1792 }
 0x3f9   :  { %2001 = vrcp.f32 %v1793_v8 }
 0x403   :  { %v2002_v60 = vpop.eup %2001 }
 0x404   :  { %v1799_v58 = vrot.slane %v2002_v60, %v2343_v10  ;;  %v1803_v28 = vrot.slane %v2002_v60, %v2346_v41  ;;  %v1807_v33 = vrot.slane %v2002_v60, %v2349_v36  ;;  %v1811_v54 = vrot.slane %v2002_v60, %v2352_v37 }
 0x405   :  { %v1815_v1 = vrot.slane %v2002_v60, %v2355_v35  ;;  %v1819_v52 = vrot.slane %v2002_v60, %v2358_v61  ;;  %v1823_v41 = vrot.slane %v2002_v60, %v2361_v6  ;;  %v1827_v36 = vrot.slane %v2002_v60, %v2364_v34 }
 0x406   :  { %v1836_v15 = vmul.f32 %v1986_v9, %v1799_v58  ;;  %v1837_v62 = vmul.f32 %v1988_v3, %v1803_v28  ;;  %v1838_v14 = vmul.f32 %v1990_v5, %v1807_v33  ;;  %v1839_v40 = vmul.f32 %v1992_v38, %v1811_v54 }
 0x407   :  { %v1840_v11 = vmul.f32 %v1994_v44, %v1815_v1  ;;  %v1841_v10 = vmul.f32 %v1996_v27, %v1819_v52  ;;  %v1842_v29 = vmul.f32 %v1998_v7, %v1823_v41  ;;  %v1843_v63 = vmul.f32 %v2000_v43, %v1827_v36 }
 0x408   :  { %1853 = vperm.xlu0 %1980, %v1836_v15  }
 0x40c   :  { %1856 = vperm.xlu0 %1980, %v1837_v62  }
 0x410   :  { %1859 = vperm.xlu0 %1980, %v1838_v14  }
 0x414   :  { %1862 = vperm.xlu0 %1980, %v1839_v40  }
 0x418   :  { %1865 = vperm.xlu0 %1980, %v1840_v11  }
 0x41c   :  { %1868 = vperm.xlu0 %1980, %v1841_v10  }
 0x420   :  { %1871 = vperm.xlu0 %1980, %v1842_v29  }
 0x424   :  { %1874 = vperm.xlu0 %1980, %v1843_v63  }
 0x487   :  { %v1854_v37 = vpop.permute.xlu0 %1853 }
 0x488   :  { %v1879_v23 = vrot.slane %v1854_v37, %v2944_v45 }
 0x48b   :  { %v1857_v12 = vpop.permute.xlu0 %1856 }
 0x48c   :  { %v1883_v31 = vrot.slane %v1857_v12, %v2944_v45 }
 0x48e   :  { %v1908_v5 = vsel %vm1635_vm1, %v1883_v31, %v1879_v23 }
 0x48f   :  { %v1860_v56 = vpop.permute.xlu0 %1859 }
 0x490   :  { %v1887_v61 = vrot.slane %v1860_v56, %v2944_v45 }
 0x492   :  { %v1909_v2 = vsel %vm1637_vm2, %v1887_v61, %v1908_v5 }
 0x493   :  { %v1863_v9 = vpop.permute.xlu0 %1862 }
 0x494   :  { %v1891_v6 = vrot.slane %v1863_v9, %v2944_v45 }
 0x496   :  { %v1910_v26 = vsel %vm1639_vm3, %v1891_v6, %v1909_v2 }
 0x497   :  { %v1866_v35 = vpop.permute.xlu0 %1865 }
 0x498   :  { %v1895_v42 = vrot.slane %v1866_v35, %v2944_v45 }
 0x49a   :  { %v1911_v44 = vsel %vm1641_vm4, %v1895_v42, %v1910_v26 }
 0x49b   :  { %v1869_v3 = vpop.permute.xlu0 %1868 }
 0x49c   :  { %v1899_v32 = vrot.slane %v1869_v3, %v2944_v45 }
 0x49e   :  { %v1912_v7 = vsel %vm1643_vm5, %v1899_v32, %v1911_v44 }
 0x49f   :  { %v1872_v34 = vpop.permute.xlu0 %1871 }
 0x4a0   :  { %v1903_v38 = vrot.slane %v1872_v34, %v2944_v45 }
 0x4a2   :  { %v1913_v46 = vsel %vm1645_vm6, %v1903_v38, %v1912_v7 }
 0x4a3   :  { %v1875_v27 = vpop.permute.xlu0 %1874 }
 0x4a4   :  { %v1907_v43 = vrot.slane %v1875_v27, %v2944_v45 }
 0x4a6   :  { %v1914_v47 = vsel %vm1647_vm7, %v1907_v43, %v1913_v46 }
 0x4a7   :  { %1916 = vst.msk [vmem:[%s2838_s6] sm:$0xff] %vm1650_vm8, %v1914_v47 }

</bundles_post_ra>
